<compile_context>
chip_gen: v5e
topology: v5e:2x2
jax: 0.10.0
libtpu: 0.0.40
codegen_flags: <defaults>
</compile_context>

<pallas_src>
import numpy as np
import jax
import jax.numpy as jnp
from jax.experimental import pallas as pl
from jax.experimental.pallas import tpu as pltpu

IN_FEA_DIM = 3
IN_FEA_PAD = 8          # zero-pad K from 3 -> 8 for layout-clean DMA / MXU
OUT_PT_FEA_DIM = 64
H1, H2, H3 = 64, 128, 256
BN_EPS = 1e-5

VMEM_LIMIT_BYTES = 32 * 1024 * 1024   # safe on v5e/v6e/v7x for these tiles


def _round_up(x, m):
    return ((x + m - 1) // m) * m


# ----------------------------------------------------------------------------
# Pallas kernel 1: fused PPmodel MLP (BN folded into the Linear layers)
# ----------------------------------------------------------------------------
def _fused_mlp_kernel(x_ref, w1, b1, w2, b2, w3, b3, w4, b4, o_ref):
    # bf16 inputs to every matmul, f32 accumulation, f32 bias/ReLU.
    x = x_ref[...].astype(jnp.bfloat16)
    h = jnp.dot(x, w1[...], preferred_element_type=jnp.float32) + b1[...]
    h = jnp.maximum(h, 0.0).astype(jnp.bfloat16)
    h = jnp.dot(h, w2[...], preferred_element_type=jnp.float32) + b2[...]
    h = jnp.maximum(h, 0.0).astype(jnp.bfloat16)
    h = jnp.dot(h, w3[...], preferred_element_type=jnp.float32) + b3[...]
    h = jnp.maximum(h, 0.0).astype(jnp.bfloat16)
    o_ref[...] = jnp.dot(h, w4[...], preferred_element_type=jnp.float32) + b4[...]


def pp_model_pallas(x, folded_params, tile_n=1024):
    """x: [N, IN_FEA_DIM] f32 -> [N, OUT_PT_FEA_DIM] f32."""
    w1, b1, w2, b2, w3, b3, w4, b4 = folded_params
    n = x.shape[0]
    if n <= tile_n:
        # Keep >= 2 row blocks when possible so the 'parallel' axis can be
        # split across both TensorCores on v7x megacore.
        tile_n = max(256, _round_up((n + 1) // 2, 256))
    n_pad = _round_up(n, tile_n)
    x_p = jnp.pad(x, ((0, n_pad - n), (0, IN_FEA_PAD - x.shape[1])))

    def const_spec(shp):
        # Weight / bias blocks never change block index.
        return pl.BlockSpec(shp, lambda i: (0, 0))

    out = pl.pallas_call(
        _fused_mlp_kernel,
        out_shape=jax.ShapeDtypeStruct((n_pad, OUT_PT_FEA_DIM), jnp.float32),
        grid=(n_pad // tile_n,),
        in_specs=[
            pl.BlockSpec((tile_n, IN_FEA_PAD), lambda i: (i, 0)),
            const_spec(w1.shape), const_spec(b1.shape),
            const_spec(w2.shape), const_spec(b2.shape),
            const_spec(w3.shape), const_spec(b3.shape),
            const_spec(w4.shape), const_spec(b4.shape),
        ],
        out_specs=pl.BlockSpec((tile_n, OUT_PT_FEA_DIM), lambda i: (i, 0)),
        compiler_params=pltpu.CompilerParams(
            dimension_semantics=("parallel",),
            vmem_limit_bytes=VMEM_LIMIT_BYTES),
    )(x_p, w1, b1, w2, b2, w3, b3, w4, b4)
    return out[:n]


# ----------------------------------------------------------------------------
# Pallas kernel 2: scatter_max over unique-voxel inverse indices (segment max)
# Points are pre-sorted by segment id; per-output-tile chunk ranges are
# scalar-prefetched so only overlapping chunks are DMA'd / computed.
# ----------------------------------------------------------------------------
def _scatter_max_kernel(clo_ref, chi_ref, inv_ref, feats_ref, o_ref, part_ref):
    i = pl.program_id(0)
    k = pl.program_id(1)
    tile_m, d = o_ref.shape
    m0 = i * tile_m

    @pl.when(k == 0)
    def _init():
        part_ref[...] = jnp.full(part_ref.shape, -jnp.inf, part_ref.dtype)

    # Only point chunks that actually contain segments of this output tile do
    # any work (chunk ranges are contiguous because points are sorted by inv).
    @pl.when(clo_ref[i] + k < chi_ref[i])
    def _compute():
        feats = feats_ref[...]                                   # [P, D] f32
        p = feats.shape[0]
        # Hoisted broadcast (JAX does not CSE broadcast_in_dim in the loop).
        inv_b = jnp.broadcast_to(inv_ref[...], feats.shape)      # [P, D] i32

        pieces = []
        for m in range(tile_m):
            cand = jnp.where(inv_b == (m0 + m), feats, -jnp.inf)  # [P, D] VPU
            # Pure-VPU tree reduction of the point axis down to 8 sublane
            # positions; the final 8 -> 1 cross-sublane (XLU) reduce is
            # deferred to the last chunk step.
            r = cand
            while r.shape[0] > 8:
                h = r.shape[0] // 2
                r = jnp.maximum(r[:h], r[h:])
            pieces.append(r)                                      # [8, D]
        new = jnp.concatenate(pieces, axis=0)                     # [tile_m*8, D]
        # One full-tile accumulate per chunk step (no per-row masked RMWs).
        part_ref[...] = jnp.maximum(part_ref[...], new)

    @pl.when(k == pl.num_programs(1) - 1)
    def _finish():
        # Deferred 8 -> 1 sublane reduction, once per output tile.
        red = part_ref[pl.ds(0, tile_m, stride=8), :]
        for s in range(1, 8):
            red = jnp.maximum(red, part_ref[pl.ds(s, tile_m, stride=8), :])
        o_ref[...] = red


def scatter_max_pallas(feats, inv, max_segments, tile_m=64, tile_np=256):
    """feats: [Np, D] f32, inv: [Np] int -> [max_segments, D] segment-max.

    max_segments is a static upper bound (rows past the true count stay -inf).
    """
    assert tile_m % 8 == 0
    assert tile_np % 8 == 0 and ((tile_np // 8) & (tile_np // 8 - 1)) == 0
    npts, d = feats.shape
    np_pad = _round_up(npts, tile_np)
    m_pad = _round_up(max_segments, tile_m)
    m_tiles = m_pad // tile_m
    n_chunks = np_pad // tile_np

    # Sort points by segment id so every segment is a contiguous run.
    order = jnp.argsort(inv)
    inv_s = inv[order].astype(jnp.int32)
    feats_s = feats[order]

    sentinel = jnp.int32(m_pad)            # never matches a real output row
    inv_p = jnp.concatenate(
        [inv_s, jnp.full((np_pad - npts,), sentinel, jnp.int32)])
    feats_p = jnp.pad(feats_s, ((0, np_pad - npts), (0, 0)))

    # Contiguous chunk range [chunk_lo, chunk_hi) overlapping each output tile.
    tile_starts = jnp.arange(m_tiles, dtype=jnp.int32) * tile_m
    pt_lo = jnp.searchsorted(inv_p, tile_starts, side='left').astype(jnp.int32)
    pt_hi = jnp.searchsorted(inv_p, tile_starts + tile_m,
                             side='left').astype(jnp.int32)
    chunk_lo = (pt_lo // tile_np).astype(jnp.int32)
    chunk_hi = jnp.where(pt_hi > pt_lo,
                         (pt_hi + tile_np - 1) // tile_np,
                         chunk_lo).astype(jnp.int32)

    def chunk_index(i, k, clo_ref, chi_ref):
        # Data-dependent chunk index: walk the overlapping range, then stick
        # to the last needed chunk (same index => the DMA is elided).
        last = jnp.maximum(clo_ref[i], chi_ref[i] - 1)
        c = jnp.minimum(jnp.minimum(clo_ref[i] + k, last), n_chunks - 1)
        return (c, 0)

    out = pl.pallas_call(
        _scatter_max_kernel,
        out_shape=jax.ShapeDtypeStruct((m_pad, d), jnp.float32),
        grid_spec=pltpu.PrefetchScalarGridSpec(
            num_scalar_prefetch=2,
            grid=(m_tiles, n_chunks),
            in_specs=[
                pl.BlockSpec((tile_np, 1), chunk_index),
                pl.BlockSpec((tile_np, d), chunk_index),
            ],
            out_specs=pl.BlockSpec((tile_m, d), lambda i, k, clo, chi: (i, 0)),
            scratch_shapes=[pltpu.VMEM((tile_m * 8, d), jnp.float32)],
        ),
        compiler_params=pltpu.CompilerParams(
            dimension_semantics=("parallel", "arbitrary"),
            vmem_limit_bytes=VMEM_LIMIT_BYTES),
    )(chunk_lo, chunk_hi, inv_p.reshape(-1, 1), feats_p)
    return out[:max_segments]


# ----------------------------------------------------------------------------
# Parameter setup (deterministic) and BatchNorm folding
# ----------------------------------------------------------------------------
def init_raw_params(key):
    ks = jax.random.split(key, 8)

    def linear(k, din, dout):
        kw, kb = jax.random.split(k)
        bound = 1.0 / np.sqrt(din)
        w = jax.random.uniform(kw, (din, dout), jnp.float32, -bound, bound)
        b = jax.random.uniform(kb, (dout,), jnp.float32, -bound, bound)
        return w, b

    def batchnorm(k, dim):
        kg, kb, km, kv = jax.random.split(k, 4)
        gamma = 1.0 + 0.1 * jax.random.normal(kg, (dim,), jnp.float32)
        beta = 0.1 * jax.random.normal(kb, (dim,), jnp.float32)
        mean = 0.1 * jax.random.normal(km, (dim,), jnp.float32)
        var = 1.0 + 0.5 * jax.random.uniform(kv, (dim,), jnp.float32)
        return gamma, beta, mean, var

    return {
        "bn0": batchnorm(ks[0], IN_FEA_DIM),
        "lin1": linear(ks[1], IN_FEA_DIM, H1),
        "bn1": batchnorm(ks[2], H1),
        "lin2": linear(ks[3], H1, H2),
        "bn2": batchnorm(ks[4], H2),
        "lin3": linear(ks[5], H2, H3),
        "bn3": batchnorm(ks[6], H3),
        "lin4": linear(ks[7], H3, OUT_PT_FEA_DIM),
    }


def fold_params(raw):
    # TODO(synk): BatchNorm1d training-mode batch statistics are not modelled;
    # inference-mode (running-stat) BN is folded into the Linear layers.
    def bn_affine(bn):
        gamma, beta, mean, var = bn
        a = gamma / jnp.sqrt(var + BN_EPS)
        c = beta - mean * a
        return a, c

    a0, c0 = bn_affine(raw["bn0"])
    a1, c1 = bn_affine(raw["bn1"])
    a2, c2 = bn_affine(raw["bn2"])
    a3, c3 = bn_affine(raw["bn3"])
    w1, b1 = raw["lin1"]
    w2, b2 = raw["lin2"]
    w3, b3 = raw["lin3"]
    w4, b4 = raw["lin4"]

    w1f = (a0[:, None] * w1) * a1[None, :]
    b1f = (c0 @ w1 + b1) * a1 + c1
    w2f = w2 * a2[None, :]
    b2f = b2 * a2 + c2
    w3f = w3 * a3[None, :]
    b3f = b3 * a3 + c3
    w4f = w4
    b4f = b4

    # Zero-pad the first layer K dim 3 -> 8, store weights in bf16
    # (MXU inputs); biases stay f32 (VPU path, fine on v5e).
    w1f = jnp.pad(w1f, ((0, IN_FEA_PAD - IN_FEA_DIM), (0, 0)))
    bf = jnp.bfloat16
    return (w1f.astype(bf), b1f.reshape(1, -1),
            w2f.astype(bf), b2f.reshape(1, -1),
            w3f.astype(bf), b3f.reshape(1, -1),
            w4f.astype(bf), b4f.reshape(1, -1))


# ----------------------------------------------------------------------------
# cylinder_fea.forward  (fea_compre=False, return_inverse=False defaults)
# ----------------------------------------------------------------------------
def cylinder_fea_forward(point_feats, pt_vox_coords, folded_params,
                         voxel_bound=None):
    # F.pad(coords, (1, 0), value=batch_idx) == prepend a batch-index column.
    cat_coords = []
    for b_idx, c in enumerate(pt_vox_coords):
        pad_col = jnp.full((c.shape[0], 1), b_idx, dtype=c.dtype)
        cat_coords.append(jnp.concatenate([pad_col, c], axis=1))
    cat_pt_fea = jnp.concatenate(point_feats, axis=0)
    cat_coords = jnp.concatenate(cat_coords, axis=0)
    pt_num = cat_coords.shape[0]

    # Static upper bound on occupied voxels: the (batch x grid) size product
    # when known — much tighter than "every point unique" and directly shrinks
    # the scatter grid / output traffic.
    max_voxels = pt_num if voxel_bound is None else min(pt_num, int(voxel_bound))

    # torch.unique(dim=0, return_inverse, return_counts) with a STATIC size
    # bound so the downstream Pallas call shapes never depend on the data.
    unq, unq_inv, unq_cnt = jnp.unique(
        cat_coords, axis=0, return_inverse=True, return_counts=True,
        size=max_voxels)
    unq_inv = unq_inv.reshape(-1).astype(jnp.int32)
    n_active = (jnp.max(unq_inv) + 1).astype(jnp.int32)
    # Note: PyTorch casts unq to int64; indices fit in int32 here (no x64).

    processed = pp_model_pallas(cat_pt_fea, folded_params)            # PPmodel
    pooled = scatter_max_pallas(processed, unq_inv, max_voxels)

    # fea_compre defaults to False -> the compression branch is skipped,
    # exactly as in the PyTorch forward.
    n_unq = int(n_active)   # host sync only at the output boundary
    return unq[:n_unq], pooled[:n_unq]


# ----------------------------------------------------------------------------
# Pure-JAX reference (same folded bf16 params / same rounding) for checking
# ----------------------------------------------------------------------------
def reference_forward(cat_pt_fea, unq_inv, num_segments, folded_params):
    w1, b1, w2, b2, w3, b3, w4, b4 = folded_params
    x = jnp.pad(cat_pt_fea, ((0, 0), (0, IN_FEA_PAD - cat_pt_fea.shape[1])))
    h = x.astype(jnp.bfloat16)
    h = jnp.dot(h, w1, preferred_element_type=jnp.float32) + b1
    h = jnp.maximum(h, 0.0).astype(jnp.bfloat16)
    h = jnp.dot(h, w2, preferred_element_type=jnp.float32) + b2
    h = jnp.maximum(h, 0.0).astype(jnp.bfloat16)
    h = jnp.dot(h, w3, preferred_element_type=jnp.float32) + b3
    h = jnp.maximum(h, 0.0).astype(jnp.bfloat16)
    h = jnp.dot(h, w4, preferred_element_type=jnp.float32) + b4
    return jax.ops.segment_max(h, unq_inv, num_segments=num_segments)


if __name__ == "__main__":
    key = jax.random.PRNGKey(0)
    k_f0, k_f1, k_c0, k_c1, k_p = jax.random.split(key, 5)

    # Two small point clouds (batch of 2); big enough to exercise multiple
    # MLP row tiles, multiple point chunks and multiple output-voxel tiles.
    n0, n1 = 300, 220
    grid_extent = 6
    feats0 = jax.random.normal(k_f0, (n0, IN_FEA_DIM), jnp.float32)
    feats1 = jax.random.normal(k_f1, (n1, IN_FEA_DIM), jnp.float32)
    coords0 = jax.random.randint(k_c0, (n0, 3), 0, grid_extent, jnp.int32)
    coords1 = jax.random.randint(k_c1, (n1, 3), 0, grid_extent, jnp.int32)

    raw_params = init_raw_params(k_p)
    folded = fold_params(raw_params)

    # Tight static voxel bound: batch * grid volume.
    voxel_bound = 2 * grid_extent ** 3

    unq, pooled = cylinder_fea_forward([feats0, feats1],
                                       [coords0, coords1], folded,
                                       voxel_bound=voxel_bound)
    pooled = jax.block_until_ready(pooled)

    # correctness check against a pure-JAX reference
    pad_col0 = jnp.zeros((n0, 1), jnp.int32)
    pad_col1 = jnp.ones((n1, 1), jnp.int32)
    cat_coords = jnp.concatenate(
        [jnp.concatenate([pad_col0, coords0], axis=1),
         jnp.concatenate([pad_col1, coords1], axis=1)], axis=0)
    cat_feats = jnp.concatenate([feats0, feats1], axis=0)
    _, ref_inv = jnp.unique(cat_coords, axis=0, return_inverse=True)
    ref_inv = ref_inv.reshape(-1)
    ref_pooled = reference_forward(cat_feats, ref_inv, unq.shape[0], folded)

    assert unq.shape[1] == 4 and pooled.shape == (unq.shape[0], OUT_PT_FEA_DIM)
    assert np.all(np.isfinite(np.asarray(pooled)))
    assert np.allclose(np.asarray(pooled), np.asarray(ref_pooled),
                       rtol=1e-3, atol=1e-3)
    print("KERNEL_OK")
</pallas_src>

<mosaic_0001>
module attributes {stable_mosaic.version = 11 : i64} {
  func.func @_fused_mlp_kernel(%arg0: i32, %arg1: memref<512x8xf32, #tpu.memory_space<vmem>>, %arg2: memref<8x64xbf16, #tpu.memory_space<vmem>>, %arg3: memref<1x64xf32, #tpu.memory_space<vmem>>, %arg4: memref<64x128xbf16, #tpu.memory_space<vmem>>, %arg5: memref<1x128xf32, #tpu.memory_space<vmem>>, %arg6: memref<128x256xbf16, #tpu.memory_space<vmem>>, %arg7: memref<1x256xf32, #tpu.memory_space<vmem>>, %arg8: memref<256x64xbf16, #tpu.memory_space<vmem>>, %arg9: memref<1x64xf32, #tpu.memory_space<vmem>>, %arg10: memref<512x64xf32, #tpu.memory_space<vmem>>) attributes {dimension_semantics = [#tpu.dimension_semantics<parallel>], iteration_bounds = array<i64: 2>, scalar_prefetch = 0 : i64, scratch_operands = 0 : i64, tpu.core_type = #tpu.core_type<tc>, window_params = [{transform_indices = @transform_0, window_bounds = array<i64: 512, 8>}, {pipeline_mode = #tpu.pipeline_mode<synchronous>, transform_indices = @transform_1, window_bounds = array<i64: 8, 64>}, {pipeline_mode = #tpu.pipeline_mode<synchronous>, transform_indices = @transform_2, window_bounds = array<i64: 1, 64>}, {pipeline_mode = #tpu.pipeline_mode<synchronous>, transform_indices = @transform_3, window_bounds = array<i64: 64, 128>}, {pipeline_mode = #tpu.pipeline_mode<synchronous>, transform_indices = @transform_4, window_bounds = array<i64: 1, 128>}, {pipeline_mode = #tpu.pipeline_mode<synchronous>, transform_indices = @transform_5, window_bounds = array<i64: 128, 256>}, {pipeline_mode = #tpu.pipeline_mode<synchronous>, transform_indices = @transform_6, window_bounds = array<i64: 1, 256>}, {pipeline_mode = #tpu.pipeline_mode<synchronous>, transform_indices = @transform_7, window_bounds = array<i64: 256, 64>}, {pipeline_mode = #tpu.pipeline_mode<synchronous>, transform_indices = @transform_8, window_bounds = array<i64: 1, 64>}, {transform_indices = @transform_9, window_bounds = array<i64: 512, 64>}]} {
    %c0 = arith.constant 0 : index
    %c0_0 = arith.constant 0 : index
    %0 = vector.load %arg1[%c0, %c0_0] : memref<512x8xf32, #tpu.memory_space<vmem>>, vector<512x8xf32>
    %1 = arith.truncf %0 : vector<512x8xf32> to vector<512x8xbf16>
    %c0_1 = arith.constant 0 : index
    %c0_2 = arith.constant 0 : index
    %2 = vector.load %arg2[%c0_1, %c0_2] : memref<8x64xbf16, #tpu.memory_space<vmem>>, vector<8x64xbf16>
    %cst = arith.constant dense<0.000000e+00> : vector<512x64xf32>
    %3 = tpu.matmul %1, %2, %cst {dimension_numbers = #tpu.dot_dimension_numbers<[1], [0], [0], [1], [0, 0, 1, 1], [], []>} : vector<512x8xbf16>, vector<8x64xbf16>, vector<512x64xf32> -> vector<512x64xf32>
    %c0_3 = arith.constant 0 : index
    %c0_4 = arith.constant 0 : index
    %4 = vector.load %arg3[%c0_3, %c0_4] : memref<1x64xf32, #tpu.memory_space<vmem>>, vector<1x64xf32>
    %5 = vector.broadcast %4 : vector<1x64xf32> to vector<512x64xf32>
    %6 = arith.addf %3, %5 : vector<512x64xf32>
    %cst_5 = arith.constant 0.000000e+00 : f32
    %7 = vector.broadcast %cst_5 : f32 to vector<512x64xf32>
    %8 = arith.maximumf %6, %7 : vector<512x64xf32>
    %9 = arith.truncf %8 : vector<512x64xf32> to vector<512x64xbf16>
    %c0_6 = arith.constant 0 : index
    %c0_7 = arith.constant 0 : index
    %10 = vector.load %arg4[%c0_6, %c0_7] : memref<64x128xbf16, #tpu.memory_space<vmem>>, vector<64x128xbf16>
    %cst_8 = arith.constant dense<0.000000e+00> : vector<512x128xf32>
    %11 = tpu.matmul %9, %10, %cst_8 {dimension_numbers = #tpu.dot_dimension_numbers<[1], [0], [0], [1], [0, 0, 1, 1], [], []>} : vector<512x64xbf16>, vector<64x128xbf16>, vector<512x128xf32> -> vector<512x128xf32>
    %c0_9 = arith.constant 0 : index
    %c0_10 = arith.constant 0 : index
    %12 = vector.load %arg5[%c0_9, %c0_10] : memref<1x128xf32, #tpu.memory_space<vmem>>, vector<1x128xf32>
    %13 = vector.broadcast %12 : vector<1x128xf32> to vector<512x128xf32>
    %14 = arith.addf %11, %13 : vector<512x128xf32>
    %cst_11 = arith.constant 0.000000e+00 : f32
    %15 = vector.broadcast %cst_11 : f32 to vector<512x128xf32>
    %16 = arith.maximumf %14, %15 : vector<512x128xf32>
    %17 = arith.truncf %16 : vector<512x128xf32> to vector<512x128xbf16>
    %c0_12 = arith.constant 0 : index
    %c0_13 = arith.constant 0 : index
    %18 = vector.load %arg6[%c0_12, %c0_13] : memref<128x256xbf16, #tpu.memory_space<vmem>>, vector<128x256xbf16>
    %cst_14 = arith.constant dense<0.000000e+00> : vector<512x256xf32>
    %19 = tpu.matmul %17, %18, %cst_14 {dimension_numbers = #tpu.dot_dimension_numbers<[1], [0], [0], [1], [0, 0, 1, 1], [], []>} : vector<512x128xbf16>, vector<128x256xbf16>, vector<512x256xf32> -> vector<512x256xf32>
    %c0_15 = arith.constant 0 : index
    %c0_16 = arith.constant 0 : index
    %20 = vector.load %arg7[%c0_15, %c0_16] : memref<1x256xf32, #tpu.memory_space<vmem>>, vector<1x256xf32>
    %21 = vector.broadcast %20 : vector<1x256xf32> to vector<512x256xf32>
    %22 = arith.addf %19, %21 : vector<512x256xf32>
    %cst_17 = arith.constant 0.000000e+00 : f32
    %23 = vector.broadcast %cst_17 : f32 to vector<512x256xf32>
    %24 = arith.maximumf %22, %23 : vector<512x256xf32>
    %25 = arith.truncf %24 : vector<512x256xf32> to vector<512x256xbf16>
    %c0_18 = arith.constant 0 : index
    %c0_19 = arith.constant 0 : index
    %26 = vector.load %arg8[%c0_18, %c0_19] : memref<256x64xbf16, #tpu.memory_space<vmem>>, vector<256x64xbf16>
    %cst_20 = arith.constant dense<0.000000e+00> : vector<512x64xf32>
    %27 = tpu.matmul %25, %26, %cst_20 {dimension_numbers = #tpu.dot_dimension_numbers<[1], [0], [0], [1], [0, 0, 1, 1], [], []>} : vector<512x256xbf16>, vector<256x64xbf16>, vector<512x64xf32> -> vector<512x64xf32>
    %c0_21 = arith.constant 0 : index
    %c0_22 = arith.constant 0 : index
    %28 = vector.load %arg9[%c0_21, %c0_22] : memref<1x64xf32, #tpu.memory_space<vmem>>, vector<1x64xf32>
    %29 = vector.broadcast %28 : vector<1x64xf32> to vector<512x64xf32>
    %30 = arith.addf %27, %29 : vector<512x64xf32>
    %c0_23 = arith.constant 0 : index
    %c0_24 = arith.constant 0 : index
    %31 = vector.load %arg10[%c0_23, %c0_24] : memref<512x64xf32, #tpu.memory_space<vmem>>, vector<512x64xf32>
    tpu.vector_store %arg10[%c0_23, %c0_24], %30 {strides = array<i32>} : memref<512x64xf32, #tpu.memory_space<vmem>>, vector<512x64xf32>,
    return
  }
  func.func @transform_0(%arg0: i32) -> (i32, i32) {
    %c0_i32 = arith.constant 0 : i32
    %c0_i32_0 = arith.constant 0 : i32
    return %arg0, %c0_i32 : i32, i32
  }
  func.func @transform_1(%arg0: i32) -> (i32, i32) {
    %c0_i32 = arith.constant 0 : i32
    %c0_i32_0 = arith.constant 0 : i32
    %c0_i32_1 = arith.constant 0 : i32
    return %c0_i32, %c0_i32_0 : i32, i32
  }
  func.func @transform_2(%arg0: i32) -> (i32, i32) {
    %c0_i32 = arith.constant 0 : i32
    %c0_i32_0 = arith.constant 0 : i32
    %c0_i32_1 = arith.constant 0 : i32
    return %c0_i32, %c0_i32_0 : i32, i32
  }
  func.func @transform_3(%arg0: i32) -> (i32, i32) {
    %c0_i32 = arith.constant 0 : i32
    %c0_i32_0 = arith.constant 0 : i32
    %c0_i32_1 = arith.constant 0 : i32
    return %c0_i32, %c0_i32_0 : i32, i32
  }
  func.func @transform_4(%arg0: i32) -> (i32, i32) {
    %c0_i32 = arith.constant 0 : i32
    %c0_i32_0 = arith.constant 0 : i32
    %c0_i32_1 = arith.constant 0 : i32
    return %c0_i32, %c0_i32_0 : i32, i32
  }
  func.func @transform_5(%arg0: i32) -> (i32, i32) {
    %c0_i32 = arith.constant 0 : i32
    %c0_i32_0 = arith.constant 0 : i32
    %c0_i32_1 = arith.constant 0 : i32
    return %c0_i32, %c0_i32_0 : i32, i32
  }
  func.func @transform_6(%arg0: i32) -> (i32, i32) {
    %c0_i32 = arith.constant 0 : i32
    %c0_i32_0 = arith.constant 0 : i32
    %c0_i32_1 = arith.constant 0 : i32
    return %c0_i32, %c0_i32_0 : i32, i32
  }
  func.func @transform_7(%arg0: i32) -> (i32, i32) {
    %c0_i32 = arith.constant 0 : i32
    %c0_i32_0 = arith.constant 0 : i32
    %c0_i32_1 = arith.constant 0 : i32
    return %c0_i32, %c0_i32_0 : i32, i32
  }
  func.func @transform_8(%arg0: i32) -> (i32, i32) {
    %c0_i32 = arith.constant 0 : i32
    %c0_i32_0 = arith.constant 0 : i32
    %c0_i32_1 = arith.constant 0 : i32
    return %c0_i32, %c0_i32_0 : i32, i32
  }
  func.func @transform_9(%arg0: i32) -> (i32, i32) {
    %c0_i32 = arith.constant 0 : i32
    %c0_i32_0 = arith.constant 0 : i32
    return %arg0, %c0_i32 : i32, i32
  }
}

</mosaic_0001>

<bundles_post_ra>
// kernel: tpu_custom_call.1
= control target key start
LH: loop header
LB: loop body
LE: loop exit
PB: predicated region body
PF: predicated region fallthrough
CT: control target
= control target key end

     0   :  { %s2762_s30 = smov 0   ;;  %s3798_s0 = inlined_call_operand.vmem [shape: f32[1024,8], index: 0, kind: input, shape index: {}]   ;;  %s3799_s1 = inlined_call_operand.vmem [shape: bf16[8,64], index: 1, kind: input, shape index: {}]   ;;  %s3800_s2 = inlined_call_operand.vmem [shape: f32[1,64], index: 2, kind: input, shape index: {}]   ;;  %s3801_s3 = inlined_call_operand.vmem [shape: bf16[64,128], index: 3, kind: input, shape index: {}]   ;;  %s3802_s4 = inlined_call_operand.vmem [shape: f32[1,128], index: 4, kind: input, shape index: {}]   ;;  %s3803_s5 = inlined_call_operand.vmem [shape: bf16[128,256], index: 5, kind: input, shape index: {}]   ;;  %s3804_s6 = inlined_call_operand.vmem [shape: f32[1,256], index: 6, kind: input, shape index: {}]   ;;  %s3805_s7 = inlined_call_operand.vmem [shape: bf16[256,64], index: 7, kind: input, shape index: {}]   ;;  %s3806_s8 = inlined_call_operand.vmem [shape: f32[1,64], index: 8, kind: input, shape index: {}]   ;;  %s3807_s9 = inlined_call_operand.vmem [shape: f32[1024,64], index: 9, kind: output, shape index: {}]  }
   0x1 LB: > { %s2424_s10 = sadd.s32 4294967295, %s2710_s30   ;;  %p2428_p0 = scmp.ge.s32.totalorder %s2710_s30, 1  ;;  %s2710_s30 = sphi %s2762_s30, %s19_s30  }
   0x2   : > { %p288_p1 = scmp.lt.s32.totalorder %s2710_s30, 3 }
   0x4   : > { %p289_p2 = pnand %p2428_p0, %p288_p1 }
   0x5   : > { %s2429_s13 = sshll.u32 (!%p289_p2), %s2424_s10, 6 }
   0x6   : > { %292 = sbr.rel (%p289_p2) target bundleno = 1185 (0x4a1), region = 56  ;;  %p325_p3 = scmp.lt.s32.totalorder (!%p289_p2), %s2429_s13, 127 }
   0xb   : > { %v433_v0 = vld [vmem:[%s3799_s1] sm:$0xf]  ;;  %vm535_vm0 = vcmask 1043456   ;;  %s3809_s13 = smov (!%p325_p3, %s2429_s13), 127  ;;  %vm438_vm1 = vcmask 64512   ;;  %v2646_v43 = vld [vmem:[%s3801_s3 + $0x18] sm:$0xff] }
   0xc   : > { %v537_v1 = vsel %vm535_vm0, %v433_v0, 0  ;;  %s2430_s14 = sshll.u32 %s3809_s13, 3  ;;  %941 = vmatpush.bf16.msra.mxu1 %v2646_v43  ;;  %2680 = vmatpush.bf16.msra.mxu2 %v2646_v43  ;;  %v2645_v45 = vld [vmem:[%s3801_s3 + $0x10] sm:$0xff]  ;;  %v2644_v46 = vld [vmem:[%s3801_s3 + $0x8] sm:$0xff]  ;;  %v2643_v47 = vld [vmem:[%s3801_s3] sm:$0xff]  ;;  %vm840_vm2 = vcmask 523264  }
   0xd   : > { %546 = vmatpush.bf16.msra.mxu0 %v537_v1  ;;  %2679 = vmatpush.bf16.msra.mxu3 %v537_v1  ;;  %s2781_s17 = scalar_lea.vmem %s3798_s0, %s2430_s14  ;;  %v2661_v54 = vld [vmem:[%s3803_s5 + $0x74] sm:$0xf]  ;;  %v2573_v55 = vld [vmem:[%s3803_s5 + $0x78] sm:$0xf0]  ;;  %v2571_v57 = vld [vmem:[%s3803_s5 + $0x70] sm:$0xf]  ;;  %s3408_s27 = scalar_lea.vmem %s3807_s9, %s2430_s14 }
   0xe   : > { %v337_v2 = vld [vmem:[%s2781_s17] sm:$0xff]  ;;  %v338_v3 = vld [vmem:[%s2781_s17 + $0x8] sm:$0xff]  ;;  %v371_v4 = vld [vmem:[%s2781_s17 + $0x110] sm:$0xff]  ;;  %v2576_v56 = vor.u32 %v2661_v54, %v2573_v55 }
   0xf   : > { %v401_v5 = vpack.c.bf16 %v338_v3, %v337_v2  ;;  %v372_v6 = vld [vmem:[%s2781_s17 + $0x118] sm:$0xff]  ;;  %v339_v8 = vld [vmem:[%s2781_s17 + $0x10] sm:$0xff]  ;;  %v373_v10 = vld [vmem:[%s2781_s17 + $0x120] sm:$0xff] }
  0x10   : > { %v418_v7 = vpack.c.bf16 %v372_v6, %v371_v4  ;;  %v340_v9 = vld [vmem:[%s2781_s17 + $0x18] sm:$0xff]  ;;  %v374_v11 = vld [vmem:[%s2781_s17 + $0x128] sm:$0xff]  ;;  %v341_v14 = vld [vmem:[%s2781_s17 + $0x20] sm:$0xff]  ;;  %942 = vmatpush.bf16.msra.mxu1 %v2645_v45  ;;  %2681 = vmatpush.bf16.msra.mxu2 %v2645_v45 }
  0x11   : > { %2433 = vmatmul.msk.bf16.vlgmr.msra.gmra.mxu0 %vm438_vm1, %v401_v5  ;;  %v402_v12 = vpack.c.bf16 %v340_v9, %v339_v8  ;;  %v419_v13 = vpack.c.bf16 %v374_v11, %v373_v10  ;;  %v342_v15 = vld [vmem:[%s2781_s17 + $0x28] sm:$0xff]  ;;  %v375_v16 = vld [vmem:[%s2781_s17 + $0x130] sm:$0xff]  ;;  %v376_v17 = vld [vmem:[%s2781_s17 + $0x138] sm:$0xff]  ;;  %1473 = vmatpush.bf16.msrb.mxu3 %v2576_v56 }
  0x12   : > { %2450 = vmatmul.msk.bf16.vlgmr.msra.gmra.mxu3 %vm438_vm1, %v418_v7  ;;  %v403_v18 = vpack.c.bf16 %v342_v15, %v341_v14  ;;  %v420_v19 = vpack.c.bf16 %v376_v17, %v375_v16  ;;  %v343_v20 = vld [vmem:[%s2781_s17 + $0x30] sm:$0xff]  ;;  %v344_v21 = vld [vmem:[%s2781_s17 + $0x38] sm:$0xff]  ;;  %v377_v22 = vld [vmem:[%s2781_s17 + $0x140] sm:$0xff] }
  0x13   : > { %v378_v23 = vld [vmem:[%s2781_s17 + $0x148] sm:$0xff]  ;;  %v404_v24 = vpack.c.bf16 %v344_v21, %v343_v20  ;;  %v345_v26 = vld [vmem:[%s2781_s17 + $0x40] sm:$0xff]  ;;  %v379_v28 = vld [vmem:[%s2781_s17 + $0x150] sm:$0xff] }
  0x14   : > { %v421_v25 = vpack.c.bf16 %v378_v23, %v377_v22  ;;  %v346_v27 = vld [vmem:[%s2781_s17 + $0x48] sm:$0xff]  ;;  %v380_v29 = vld [vmem:[%s2781_s17 + $0x158] sm:$0xff]  ;;  %v347_v32 = vld [vmem:[%s2781_s17 + $0x50] sm:$0xff]  ;;  %943 = vmatpush.bf16.msra.mxu1 %v2644_v46  ;;  %2682 = vmatpush.bf16.msra.mxu2 %v2644_v46 }
  0x15   : > { %v405_v30 = vpack.c.bf16 %v346_v27, %v345_v26  ;;  %v422_v31 = vpack.c.bf16 %v380_v29, %v379_v28  ;;  %v348_v33 = vld [vmem:[%s2781_s17 + $0x58] sm:$0xff]  ;;  %v381_v34 = vld [vmem:[%s2781_s17 + $0x160] sm:$0xff]  ;;  %v382_v35 = vld [vmem:[%s2781_s17 + $0x168] sm:$0xff] }
  0x16   : > { %v406_v36 = vpack.c.bf16 %v348_v33, %v347_v32  ;;  %v423_v37 = vpack.c.bf16 %v382_v35, %v381_v34  ;;  %v349_v38 = vld [vmem:[%s2781_s17 + $0x60] sm:$0xff]  ;;  %v350_v39 = vld [vmem:[%s2781_s17 + $0x68] sm:$0xff]  ;;  %v383_v40 = vld [vmem:[%s2781_s17 + $0x170] sm:$0xff] }
  0x17   : > { %v384_v41 = vld [vmem:[%s2781_s17 + $0x178] sm:$0xff]  ;;  %v407_v42 = vpack.c.bf16 %v350_v39, %v349_v38  ;;  %v351_v48 = vld [vmem:[%s2781_s17 + $0x70] sm:$0xff]  ;;  %v385_v50 = vld [vmem:[%s2781_s17 + $0x180] sm:$0xff] }
  0x18   : > { %v424_v44 = vpack.c.bf16 %v384_v41, %v383_v40  ;;  %v352_v49 = vld [vmem:[%s2781_s17 + $0x78] sm:$0xff]  ;;  %v386_v51 = vld [vmem:[%s2781_s17 + $0x188] sm:$0xff]  ;;  %944 = vmatpush.bf16.msra.mxu1 %v2643_v47  ;;  %2683 = vmatpush.bf16.msra.mxu2 %v2643_v47  ;;  %v353_v60 = vld [vmem:[%s2781_s17 + $0x80] sm:$0xff] }
  0x19   : > { %v408_v52 = vpack.c.bf16 %v352_v49, %v351_v48  ;;  %v425_v53 = vpack.c.bf16 %v386_v51, %v385_v50  ;;  %v2662_v58 = vld [vmem:[%s3803_s5 + $0x74] sm:$0xf0]  ;;  %v354_v61 = vld [vmem:[%s2781_s17 + $0x88] sm:$0xff]  ;;  %v387_v62 = vld [vmem:[%s2781_s17 + $0x190] sm:$0xff] }
  0x1a   : > { %v2572_v59 = vor.u32 %v2662_v58, %v2571_v57  ;;  %v388_v63 = vld [vmem:[%s2781_s17 + $0x198] sm:$0xff]  ;;  %v409_v0 = vpack.c.bf16 %v354_v61, %v353_v60  ;;  %v2862_v3 = vld [vmem:[%s3800_s2] ss:$0 sm:$0xff]  ;;  %v355_v10 = vld [vmem:[%s2781_s17 + $0x90] sm:$0xff] }
  0x1b   : > { %v426_v2 = vpack.c.bf16 %v388_v63, %v387_v62  ;;  %v356_v11 = vld [vmem:[%s2781_s17 + $0x98] sm:$0xff]  ;;  %v390_v14 = vld [vmem:[%s2781_s17 + $0x1a8] sm:$0xff]  ;;  %v2659_v23 = vld [vmem:[%s3803_s5 + $0x64] sm:$0xf] }
  0x1c   : > { %1304 = vmatpush.bf16.msrb.mxu2 %v2572_v59  ;;  %v410_v17 = vpack.c.bf16 %v356_v11, %v355_v10  ;;  %v2563_v27 = vld [vmem:[%s3803_s5 + $0x60] sm:$0xf]  ;;  %v2660_v28 = vld [vmem:[%s3803_s5 + $0x64] sm:$0xf0]  ;;  %v391_v39 = vld [vmem:[%s2781_s17 + $0x1b0] sm:$0xff] }
  0x1d   : > { %v392_v40 = vld [vmem:[%s2781_s17 + $0x1b8] sm:$0xff]  ;;  %v2657_v56 = vld [vmem:[%s3803_s5 + $0x54] sm:$0xf]  ;;  %v393_v62 = vld [vmem:[%s2781_s17 + $0x1c0] sm:$0xff] }
  0x1e   : > { %v428_v46 = vpack.c.bf16 %v392_v40, %v391_v39  ;;  %v2557_v57 = vld [vmem:[%s3803_s5 + $0x58] sm:$0xf0]  ;;  %v359_v58 = vld [vmem:[%s2781_s17 + $0xb0] sm:$0xff]  ;;  %v394_v63 = vld [vmem:[%s2781_s17 + $0x1c8] sm:$0xff] }
  0x1f   : > { %v360_v59 = vld [vmem:[%s2781_s17 + $0xb8] sm:$0xff]  ;;  %v2560_v60 = vor.u32 %v2657_v56, %v2557_v57  ;;  %v2655_v39 = vld [vmem:[%s3803_s5 + $0x44] sm:$0xf]  ;;  %v2549_v40 = vld [vmem:[%s3803_s5 + $0x48] sm:$0xf0] }
  0x20   : > { %v2658_v10 = vld [vmem:[%s3803_s5 + $0x54] sm:$0xf0]  ;;  %v2656_v56 = vld [vmem:[%s3803_s5 + $0x44] sm:$0xf0] }
  0x21   : > { %2434 = vmatmul.msk.bf16.gmra.mxu0 %vm438_vm1, %v402_v12 }
  0x22   : > { %2451 = vmatmul.msk.bf16.gmra.mxu3 %vm438_vm1, %v419_v13  ;;  %v389_v13 = vld [vmem:[%s2781_s17 + $0x1a0] sm:$0xff] }
  0x23   : > { %v427_v20 = vpack.c.bf16 %v390_v14, %v389_v13 }
  0x31   : > { %2435 = vmatmul.msk.bf16.gmra.mxu0 %vm438_vm1, %v403_v18 }
  0x32   : > { %2452 = vmatmul.msk.bf16.gmra.mxu3 %vm438_vm1, %v420_v19 }
  0x41   : > { %2436 = vmatmul.msk.bf16.gmra.mxu0 %vm438_vm1, %v404_v24  ;;  %v2565_v24 = vld [vmem:[%s3803_s5 + $0x68] sm:$0xf0] }
  0x42   : > { %2453 = vmatmul.msk.bf16.gmra.mxu3 %vm438_vm1, %v421_v25  ;;  %v2568_v25 = vor.u32 %v2659_v23, %v2565_v24  ;;  %v396_v23 = vld [vmem:[%s2781_s17 + $0x1d8] sm:$0xff] }
  0x44   : > { %1474 = vmatpush.bf16.msrb.mxu3 %v2568_v25 }
  0x48   : > { %1475 = vmatpush.bf16.msrb.mxu3 %v2560_v60 }
  0x51   : > { %2437 = vmatmul.msk.bf16.gmra.mxu0 %vm438_vm1, %v405_v30  ;;  %v2564_v30 = vor.u32 %v2660_v28, %v2563_v27 }
  0x52   : > { %2454 = vmatmul.msk.bf16.gmra.mxu3 %vm438_vm1, %v422_v31 }
  0x53   : > { %1305 = vmatpush.bf16.msrb.mxu2 %v2564_v30 }
  0x61   : > { %2438 = vmatmul.msk.bf16.gmra.mxu0 %vm438_vm1, %v406_v36  ;;  %v357_v36 = vld [vmem:[%s2781_s17 + $0xa0] sm:$0xff] }
  0x62   : > { %2455 = vmatmul.msk.bf16.gmra.mxu3 %vm438_vm1, %v423_v37  ;;  %v358_v37 = vld [vmem:[%s2781_s17 + $0xa8] sm:$0xff] }
  0x63   : > { %v411_v43 = vpack.c.bf16 %v358_v37, %v357_v36 }
  0x71   : > { %2439 = vmatmul.msk.bf16.gmra.mxu0 %vm438_vm1, %v407_v42 }
  0x72   : > { %2456 = vmatmul.msk.bf16.gmra.mxu3 %vm438_vm1, %v424_v44 }
  0x81   : > { %2440 = vmatmul.msk.bf16.gmra.mxu0 %vm438_vm1, %v408_v52 }
  0x82   : > { %2457 = vmatmul.msk.bf16.gmra.mxu3 %vm438_vm1, %v425_v53 }
  0x8e   : > { %v548_v1 = vpop.f32.mrf.mxu0 }
  0x8f   : > { %v549_v4 = vadd.f32 %v2862_v3, %v548_v1 }
  0x91   : > { %2441 = vmatmul.msk.bf16.gmra.mxu0 %vm438_vm1, %v409_v0  ;;  %v708_v7 = vmax.f32 %v549_v4, 0.0 }
  0x92   : > { %2458 = vmatmul.msk.bf16.gmra.mxu3 %vm438_vm1, %v426_v2  ;;  %v412_v2 = vpack.c.bf16 %v360_v59, %v359_v58 }
  0x95   : > { %v633_v5 = vpop.f32.mrf.mxu3 }
  0x96   : > { %v550_v6 = vpop.f32.mrf.mxu0  ;;  %v634_v15 = vadd.f32 %v2862_v3, %v633_v5 }
  0x97   : > { %v551_v8 = vadd.f32 %v2862_v3, %v550_v6  ;;  %v429_v6 = vpack.c.bf16 %v394_v63, %v393_v62 }
  0x98   : > { %v742_v21 = vmax.f32 %v634_v15, 0.0 }
  0x99   : > { %v709_v9 = vmax.f32 %v551_v8, 0.0 }
  0x9b   : > { %v772_v12 = vpack.c.bf16 %v709_v9, %v708_v7  ;;  %v2555_v9 = vld [vmem:[%s3803_s5 + $0x50] sm:$0xf] }
  0x9d   : > { %v635_v16 = vpop.f32.mrf.mxu3  ;;  %2481 = vmatmul.msk.bf16.vlgmr.msra.gmra.mxu1 %vm840_vm2, %v772_v12  ;;  %v2556_v12 = vor.u32 %v2658_v10, %v2555_v9 }
  0x9e   : > { %v636_v18 = vadd.f32 %v2862_v3, %v635_v16  ;;  %v553_v19 = vpop.f32.mrf.mxu0 }
  0x9f   : > { %v554_v29 = vadd.f32 %v2862_v3, %v553_v19  ;;  %1306 = vmatpush.bf16.msrb.mxu2 %v2556_v12  ;;  %v361_v19 = vld [vmem:[%s2781_s17 + $0xc0] sm:$0xff] }
  0xa0   : > { %v743_v22 = vmax.f32 %v636_v18, 0.0 }
  0xa1   : > { %2442 = vmatmul.msk.bf16.gmra.mxu0 %vm438_vm1, %v410_v17  ;;  %v710_v33 = vmax.f32 %v554_v29, 0.0 }
  0xa2   : > { %2459 = vmatmul.msk.bf16.gmra.mxu3 %vm438_vm1, %v427_v20  ;;  %v789_v26 = vpack.c.bf16 %v743_v22, %v742_v21  ;;  %v362_v20 = vld [vmem:[%s2781_s17 + $0xc8] sm:$0xff]  ;;  %v395_v22 = vld [vmem:[%s2781_s17 + $0x1d0] sm:$0xff] }
  0xa3   : > { %v430_v29 = vpack.c.bf16 %v396_v23, %v395_v22  ;;  %v2653_v22 = vld [vmem:[%s3803_s5 + $0x34] sm:$0xf]  ;;  %v2541_v23 = vld [vmem:[%s3803_s5 + $0x38] sm:$0xf0] }
  0xa4   : > { %2498 = vmatmul.msk.bf16.vlgmr.msra.gmra.mxu2 %vm840_vm2, %v789_v26  ;;  %v413_v26 = vpack.c.bf16 %v362_v20, %v361_v19 }
  0xa5   : > { %v638_v31 = vpop.f32.mrf.mxu3 }
  0xa6   : > { %v555_v32 = vpop.f32.mrf.mxu0  ;;  %v639_v41 = vadd.f32 %v2862_v3, %v638_v31 }
  0xa7   : > { %v556_v34 = vadd.f32 %v2862_v3, %v555_v32 }
  0xa8   : > { %v744_v47 = vmax.f32 %v639_v41, 0.0  ;;  %v363_v41 = vld [vmem:[%s2781_s17 + $0xd0] sm:$0xff] }
  0xa9   : > { %v711_v35 = vmax.f32 %v556_v34, 0.0 }
  0xab   : > { %v773_v38 = vpack.c.bf16 %v711_v35, %v710_v33 }
  0xad   : > { %v640_v42 = vpop.f32.mrf.mxu3  ;;  %2482 = vmatmul.msk.bf16.gmra.mxu1 %vm840_vm2, %v773_v38 }
  0xae   : > { %v641_v44 = vadd.f32 %v2862_v3, %v640_v42  ;;  %v558_v45 = vpop.f32.mrf.mxu0  ;;  %v364_v42 = vld [vmem:[%s2781_s17 + $0xd8] sm:$0xff] }
  0xaf   : > { %v559_v50 = vadd.f32 %v2862_v3, %v558_v45  ;;  %v397_v45 = vld [vmem:[%s2781_s17 + $0x1e0] sm:$0xff] }
  0xb0   : > { %v745_v48 = vmax.f32 %v641_v44, 0.0 }
  0xb1   : > { %2443 = vmatmul.msk.bf16.gmra.mxu0 %vm438_vm1, %v411_v43  ;;  %v712_v53 = vmax.f32 %v559_v50, 0.0  ;;  %v2552_v43 = vor.u32 %v2655_v39, %v2549_v40 }
  0xb2   : > { %2460 = vmatmul.msk.bf16.gmra.mxu3 %vm438_vm1, %v428_v46  ;;  %v790_v49 = vpack.c.bf16 %v745_v48, %v744_v47  ;;  %v398_v46 = vld [vmem:[%s2781_s17 + $0x1e8] sm:$0xff] }
  0xb3   : > { %1476 = vmatpush.bf16.msrb.mxu3 %v2552_v43  ;;  %v2525_v43 = vld [vmem:[%s3803_s5 + $0x18] sm:$0xf0] }
  0xb4   : > { %2499 = vmatmul.msk.bf16.gmra.mxu2 %vm840_vm2, %v790_v49  ;;  %v414_v49 = vpack.c.bf16 %v364_v42, %v363_v41  ;;  %v2649_v42 = vld [vmem:[%s3803_s5 + $0x14] sm:$0xf] }
  0xb5   : > { %v643_v51 = vpop.f32.mrf.mxu3 }
  0xb6   : > { %v560_v52 = vpop.f32.mrf.mxu0  ;;  %v644_v0 = vadd.f32 %v2862_v3, %v643_v51 }
  0xb7   : > { %v561_v54 = vadd.f32 %v2862_v3, %v560_v52  ;;  %v431_v52 = vpack.c.bf16 %v398_v46, %v397_v45 }
  0xb8   : > { %v746_v7 = vmax.f32 %v644_v0, 0.0 }
  0xb9   : > { %v713_v55 = vmax.f32 %v561_v54, 0.0 }
  0xbb   : > { %v774_v61 = vpack.c.bf16 %v713_v55, %v712_v53  ;;  %v2547_v55 = vld [vmem:[%s3803_s5 + $0x40] sm:$0xf] }
  0xbc   : > { %v2548_v57 = vor.u32 %v2656_v56, %v2547_v55  ;;  %v369_v55 = vld [vmem:[%s2781_s17 + $0x100] sm:$0xff]  ;;  %v370_v56 = vld [vmem:[%s2781_s17 + $0x108] sm:$0xff] }
  0xbd   : > { %v645_v1 = vpop.f32.mrf.mxu3  ;;  %2483 = vmatmul.msk.bf16.gmra.mxu1 %vm840_vm2, %v774_v61 }
  0xbe   : > { %v646_v4 = vadd.f32 %v2862_v3, %v645_v1  ;;  %v563_v5 = vpop.f32.mrf.mxu0  ;;  %1307 = vmatpush.bf16.msrb.mxu2 %v2548_v57  ;;  %v365_v1 = vld [vmem:[%s2781_s17 + $0xe0] sm:$0xff]  ;;  %v2678_v57 = vld [vmem:[%s3805_s7 + $0x78] sm:$0xff] }
  0xbf   : > { %v564_v13 = vadd.f32 %v2862_v3, %v563_v5  ;;  %v399_v5 = vld [vmem:[%s2781_s17 + $0x1f0] sm:$0xff]  ;;  %2135 = vmatpush.bf16.msrb.mxu1 %v2678_v57 }
  0xc0   : > { %v747_v8 = vmax.f32 %v646_v4, 0.0 }
  0xc1   : > { %2444 = vmatmul.msk.bf16.gmra.mxu0 %vm438_vm1, %v412_v2  ;;  %v714_v16 = vmax.f32 %v564_v13, 0.0  ;;  %v366_v2 = vld [vmem:[%s2781_s17 + $0xe8] sm:$0xff] }
  0xc2   : > { %2461 = vmatmul.msk.bf16.gmra.mxu3 %vm438_vm1, %v429_v6  ;;  %v791_v11 = vpack.c.bf16 %v747_v8, %v746_v7  ;;  %v400_v6 = vld [vmem:[%s2781_s17 + $0x1f8] sm:$0xff]  ;;  %v415_v9 = vpack.c.bf16 %v366_v2, %v365_v1 }
  0xc3   : > { %v432_v12 = vpack.c.bf16 %v400_v6, %v399_v5 }
  0xc4   : > { %2500 = vmatmul.msk.bf16.gmra.mxu2 %vm840_vm2, %v791_v11 }
  0xc5   : > { %v648_v14 = vpop.f32.mrf.mxu3 }
  0xc6   : > { %v565_v15 = vpop.f32.mrf.mxu0  ;;  %v649_v24 = vadd.f32 %v2862_v3, %v648_v14 }
  0xc7   : > { %v566_v17 = vadd.f32 %v2862_v3, %v565_v15 }
  0xc8   : > { %v748_v30 = vmax.f32 %v649_v24, 0.0 }
  0xc9   : > { %v715_v18 = vmax.f32 %v566_v17, 0.0 }
  0xcb   : > { %v775_v21 = vpack.c.bf16 %v715_v18, %v714_v16 }
  0xcd   : > { %v650_v25 = vpop.f32.mrf.mxu3  ;;  %2484 = vmatmul.msk.bf16.gmra.mxu1 %vm840_vm2, %v775_v21  ;;  %v2670_v21 = vld [vmem:[%s3805_s7 + $0x38] sm:$0xff] }
  0xce   : > { %v651_v27 = vadd.f32 %v2862_v3, %v650_v25  ;;  %v568_v28 = vpop.f32.mrf.mxu0  ;;  %v2544_v25 = vor.u32 %v2653_v22, %v2541_v23  ;;  %1966 = vmatpush.bf16.msrb.mxu0 %v2670_v21 }
  0xcf   : > { %v569_v33 = vadd.f32 %v2862_v3, %v568_v28 }
  0xd0   : > { %v749_v31 = vmax.f32 %v651_v27, 0.0  ;;  %v368_v27 = vld [vmem:[%s2781_s17 + $0xf8] sm:$0xff]  ;;  %1477 = vmatpush.bf16.msrb.mxu3 %v2544_v25 }
  0xd1   : > { %2445 = vmatmul.msk.bf16.gmra.mxu0 %vm438_vm1, %v413_v26  ;;  %v716_v36 = vmax.f32 %v569_v33, 0.0  ;;  %v367_v26 = vld [vmem:[%s2781_s17 + $0xf0] sm:$0xff] }
  0xd2   : > { %2462 = vmatmul.msk.bf16.gmra.mxu3 %vm438_vm1, %v430_v29  ;;  %v792_v32 = vpack.c.bf16 %v749_v31, %v748_v30  ;;  %v2651_v30 = vld [vmem:[%s3803_s5 + $0x24] sm:$0xf]  ;;  %v2533_v31 = vld [vmem:[%s3803_s5 + $0x28] sm:$0xf0]  ;;  %v416_v33 = vpack.c.bf16 %v368_v27, %v367_v26 }
  0xd4   : > { %2501 = vmatmul.msk.bf16.gmra.mxu2 %vm840_vm2, %v792_v32 }
  0xd5   : > { %v653_v34 = vpop.f32.mrf.mxu3 }
  0xd6   : > { %v570_v35 = vpop.f32.mrf.mxu0  ;;  %v654_v47 = vadd.f32 %v2862_v3, %v653_v34  ;;  %v2539_v34 = vld [vmem:[%s3803_s5 + $0x30] sm:$0xf] }
  0xd7   : > { %v571_v37 = vadd.f32 %v2862_v3, %v570_v35  ;;  %v2654_v35 = vld [vmem:[%s3803_s5 + $0x34] sm:$0xf0] }
  0xd8   : > { %v750_v53 = vmax.f32 %v654_v47, 0.0  ;;  %v2540_v39 = vor.u32 %v2654_v35, %v2539_v34  ;;  %v2647_v47 = vld [vmem:[%s3803_s5 + $0x4] sm:$0xf] }
  0xd9   : > { %v717_v38 = vmax.f32 %v571_v37, 0.0 }
  0xda   : > { %1308 = vmatpush.bf16.msrb.mxu2 %v2540_v39 }
  0xdb   : > { %v776_v44 = vpack.c.bf16 %v717_v38, %v716_v36  ;;  %v2536_v36 = vor.u32 %v2651_v30, %v2533_v31 }
  0xdd   : > { %v655_v48 = vpop.f32.mrf.mxu3  ;;  %2485 = vmatmul.msk.bf16.gmra.mxu1 %vm840_vm2, %v776_v44  ;;  %1478 = vmatpush.bf16.msrb.mxu3 %v2536_v36  ;;  %v2528_v44 = vor.u32 %v2649_v42, %v2525_v43 }
  0xde   : > { %v656_v50 = vadd.f32 %v2862_v3, %v655_v48  ;;  %v573_v51 = vpop.f32.mrf.mxu0  ;;  %v2517_v48 = vld [vmem:[%s3803_s5 + $0x8] sm:$0xf0] }
  0xdf   : > { %v574_v59 = vadd.f32 %v2862_v3, %v573_v51 }
  0xe0   : > { %v751_v54 = vmax.f32 %v656_v50, 0.0  ;;  %v2520_v50 = vor.u32 %v2647_v47, %v2517_v48 }
  0xe1   : > { %2446 = vmatmul.msk.bf16.gmra.mxu0 %vm438_vm1, %v414_v49  ;;  %v718_v62 = vmax.f32 %v574_v59, 0.0  ;;  %1479 = vmatpush.bf16.msrb.mxu3 %v2528_v44 }
  0xe2   : > { %2463 = vmatmul.msk.bf16.gmra.mxu3 %vm438_vm1, %v431_v52  ;;  %v793_v58 = vpack.c.bf16 %v751_v54, %v750_v53 }
  0xe4   : > { %2502 = vmatmul.msk.bf16.gmra.mxu2 %vm840_vm2, %v793_v58 }
  0xe5   : > { %v658_v60 = vpop.f32.mrf.mxu3  ;;  %1480 = vmatpush.bf16.msrb.mxu3 %v2520_v50 }
  0xe6   : > { %v575_v61 = vpop.f32.mrf.mxu0  ;;  %v659_v7 = vadd.f32 %v2862_v3, %v658_v60 }
  0xe7   : > { %v576_v63 = vadd.f32 %v2862_v3, %v575_v61  ;;  %v417_v61 = vpack.c.bf16 %v370_v56, %v369_v55 }
  0xe8   : > { %v752_v13 = vmax.f32 %v659_v7, 0.0 }
  0xe9   : > { %v719_v0 = vmax.f32 %v576_v63, 0.0  ;;  %2684 = vmatpush.bf16.msra.mxu3 %v2678_v57 }
  0xeb   : > { %v777_v4 = vpack.c.bf16 %v719_v0, %v718_v62 }
  0xed   : > { %v660_v8 = vpop.f32.mrf.mxu3  ;;  %2486 = vmatmul.msk.bf16.gmra.mxu1 %vm840_vm2, %v777_v4 }
  0xee   : > { %v661_v10 = vadd.f32 %v2862_v3, %v660_v8  ;;  %v578_v11 = vpop.f32.mrf.mxu0 }
  0xef   : > { %v579_v16 = vadd.f32 %v2862_v3, %v578_v11  ;;  %v2669_v11 = vld [vmem:[%s3805_s7 + $0x30] sm:$0xff] }
  0xf0   : > { %v753_v14 = vmax.f32 %v661_v10, 0.0  ;;  %1967 = vmatpush.bf16.msrb.mxu0 %v2669_v11 }
  0xf1   : > { %2447 = vmatmul.msk.bf16.gmra.mxu0 %vm438_vm1, %v415_v9  ;;  %v720_v19 = vmax.f32 %v579_v16, 0.0 }
  0xf2   : > { %2464 = vmatmul.msk.bf16.gmra.mxu3 %vm438_vm1, %v432_v12  ;;  %v794_v15 = vpack.c.bf16 %v753_v14, %v752_v13  ;;  %v2531_v12 = vld [vmem:[%s3803_s5 + $0x20] sm:$0xf]  ;;  %v2652_v13 = vld [vmem:[%s3803_s5 + $0x24] sm:$0xf0] }
  0xf3   : > { %v3042_v14 = vld [vmem:[%s3802_s4] ss:$0 sm:$0xff]  ;;  %v2532_v16 = vor.u32 %v2652_v13, %v2531_v12 }
  0xf4   : > { %2503 = vmatmul.msk.bf16.gmra.mxu2 %vm840_vm2, %v794_v15 }
  0xf5   : > { %v663_v17 = vpop.f32.mrf.mxu3  ;;  %1309 = vmatpush.bf16.msrb.mxu2 %v2532_v16 }
  0xf6   : > { %v580_v18 = vpop.f32.mrf.mxu0  ;;  %v664_v29 = vadd.f32 %v2862_v3, %v663_v17 }
  0xf7   : > { %v581_v20 = vadd.f32 %v2862_v3, %v580_v18 }
  0xf8   : > { %v754_v40 = vmax.f32 %v664_v29, 0.0 }
  0xf9   : > { %v721_v24 = vmax.f32 %v581_v20, 0.0 }
  0xfb   : > { %v778_v28 = vpack.c.bf16 %v721_v24, %v720_v19 }
  0xfd   : > { %v665_v32 = vpop.f32.mrf.mxu3  ;;  %2487 = vmatmul.msk.bf16.gmra.mxu1 %vm840_vm2, %v778_v28 }
  0xfe   : > { %v666_v37 = vadd.f32 %v2862_v3, %v665_v32  ;;  %v583_v38 = vpop.f32.mrf.mxu0 }
  0xff   : > { %v584_v46 = vadd.f32 %v2862_v3, %v583_v38  ;;  %v2677_v38 = vld [vmem:[%s3805_s7 + $0x70] sm:$0xff] }
 0x100   : > { %v755_v41 = vmax.f32 %v666_v37, 0.0  ;;  %2136 = vmatpush.bf16.msrb.mxu1 %v2677_v38  ;;  %2685 = vmatpush.bf16.msra.mxu3 %v2677_v38 }
 0x101   : > { %2448 = vmatmul.msk.bf16.gmra.mxu0 %vm438_vm1, %v416_v33  ;;  %v722_v52 = vmax.f32 %v584_v46, 0.0 }
 0x102   : > { %v795_v45 = vpack.c.bf16 %v755_v41, %v754_v40 }
 0x104   : > { %2504 = vmatmul.msk.bf16.gmra.mxu2 %vm840_vm2, %v795_v45 }
 0x105   : > { %v668_v49 = vpop.f32.mrf.mxu3 }
 0x106   : > { %v585_v51 = vpop.f32.mrf.mxu0  ;;  %v669_v59 = vadd.f32 %v2862_v3, %v668_v49 }
 0x107   : > { %v586_v53 = vadd.f32 %v2862_v3, %v585_v51 }
 0x108   : > { %v756_v0 = vmax.f32 %v669_v59, 0.0 }
 0x109   : > { %v723_v54 = vmax.f32 %v586_v53, 0.0 }
 0x10b   : > { %v779_v58 = vpack.c.bf16 %v723_v54, %v722_v52 }
 0x10d   : > { %v670_v60 = vpop.f32.mrf.mxu3  ;;  %2488 = vmatmul.msk.bf16.gmra.mxu1 %vm840_vm2, %v779_v58 }
 0x10e   : > { %v671_v62 = vadd.f32 %v2862_v3, %v670_v60  ;;  %v588_v63 = vpop.f32.mrf.mxu0 }
 0x10f   : > { %v589_v4 = vadd.f32 %v2862_v3, %v588_v63 }
 0x110   : > { %v757_v1 = vmax.f32 %v671_v62, 0.0 }
 0x111   : > { %2449 = vmatmul.msk.bf16.gmra.mxu0 %vm438_vm1, %v417_v61  ;;  %v724_v7 = vmax.f32 %v589_v4, 0.0 }
 0x112   : > { %v796_v2 = vpack.c.bf16 %v757_v1, %v756_v0 }
 0x114   : > { %2505 = vmatmul.msk.bf16.gmra.mxu2 %vm840_vm2, %v796_v2 }
 0x115   : > { %v673_v5 = vpop.f32.mrf.mxu3 }
 0x116   : > { %v590_v6 = vpop.f32.mrf.mxu0  ;;  %v674_v17 = vadd.f32 %v2862_v3, %v673_v5  ;;  %v2523_v5 = vld [vmem:[%s3803_s5 + $0x10] sm:$0xf] }
 0x117   : > { %v591_v8 = vadd.f32 %v2862_v3, %v590_v6  ;;  %v2650_v6 = vld [vmem:[%s3803_s5 + $0x14] sm:$0xf0] }
 0x118   : > { %v758_v22 = vmax.f32 %v674_v17, 0.0 }
 0x119   : > { %v725_v9 = vmax.f32 %v591_v8, 0.0 }
 0x11a   : > { %v946_v10 = vpop.f32.mrf.mxu1 }
 0x11b   : > { %v780_v15 = vpack.c.bf16 %v725_v9, %v724_v7  ;;  %v947_v21 = vadd.f32 %v3042_v14, %v946_v10  ;;  %v2668_v7 = vld [vmem:[%s3805_s7 + $0x28] sm:$0xff]  ;;  %v2524_v9 = vor.u32 %v2650_v6, %v2523_v5 }
 0x11c   : > { %1968 = vmatpush.bf16.msrb.mxu0 %v2668_v7  ;;  %v2648_v5 = vld [vmem:[%s3803_s5 + $0x4] sm:$0xf0] }
 0x11d   : > { %v675_v18 = vpop.f32.mrf.mxu3  ;;  %2489 = vmatmul.msk.bf16.gmra.mxu1 %vm840_vm2, %v780_v15  ;;  %v1106_v26 = vmax.f32 %v947_v21, 0.0  ;;  %1310 = vmatpush.bf16.msrb.mxu2 %v2524_v9 }
 0x11e   : > { %v676_v19 = vadd.f32 %v2862_v3, %v675_v18  ;;  %v593_v20 = vpop.f32.mrf.mxu0 }
 0x11f   : > { %v594_v27 = vadd.f32 %v2862_v3, %v593_v20 }
 0x120   : > { %v759_v23 = vmax.f32 %v676_v19, 0.0 }
 0x121   : > { %v726_v32 = vmax.f32 %v594_v27, 0.0 }
 0x122   : > { %v948_v24 = vpop.f32.mrf.mxu1  ;;  %v797_v25 = vpack.c.bf16 %v759_v23, %v758_v22 }
 0x123   : > { %v949_v28 = vadd.f32 %v3042_v14, %v948_v24 }
 0x124   : > { %2506 = vmatmul.msk.bf16.gmra.mxu2 %vm840_vm2, %v797_v25 }
 0x125   : > { %v1107_v29 = vmax.f32 %v949_v28, 0.0  ;;  %v678_v30 = vpop.f32.mrf.mxu3 }
 0x126   : > { %v595_v31 = vpop.f32.mrf.mxu0  ;;  %v679_v40 = vadd.f32 %v2862_v3, %v678_v30 }
 0x127   : > { %v3051_v33 = vpack.c.bf16 %v1107_v29, %v1106_v26  ;;  %v596_v34 = vadd.f32 %v2862_v3, %v595_v31  ;;  %v1031_v35 = vpop.f32.mrf.mxu2 }
 0x128   : > { %v1032_v42 = vadd.f32 %v3042_v14, %v1031_v35  ;;  %v760_v47 = vmax.f32 %v679_v40, 0.0 }
 0x129   : > { %v727_v36 = vmax.f32 %v596_v34, 0.0  ;;  %1481 = vmatmul.bf16.vlgmr.msrb.gmra.mxu3 %v3051_v33 }
 0x12a   : > { %v951_v37 = vpop.f32.mrf.mxu1  ;;  %v1140_v50 = vmax.f32 %v1032_v42, 0.0 }
 0x12b   : > { %v781_v39 = vpack.c.bf16 %v727_v36, %v726_v32  ;;  %v952_v45 = vadd.f32 %v3042_v14, %v951_v37 }
 0x12d   : > { %v680_v41 = vpop.f32.mrf.mxu3  ;;  %2490 = vmatmul.msk.bf16.gmra.mxu1 %vm840_vm2, %v781_v39  ;;  %v1108_v54 = vmax.f32 %v952_v45, 0.0 }
 0x12e   : > { %v681_v43 = vadd.f32 %v2862_v3, %v680_v41  ;;  %v598_v44 = vpop.f32.mrf.mxu0  ;;  %v2676_v41 = vld [vmem:[%s3805_s7 + $0x68] sm:$0xff] }
 0x12f   : > { %v1033_v46 = vpop.f32.mrf.mxu2  ;;  %v599_v55 = vadd.f32 %v2862_v3, %v598_v44  ;;  %2137 = vmatpush.bf16.msrb.mxu1 %v2676_v41  ;;  %2686 = vmatpush.bf16.msra.mxu3 %v2676_v41 }
 0x130   : > { %v761_v48 = vmax.f32 %v681_v43, 0.0  ;;  %v1034_v49 = vadd.f32 %v3042_v14, %v1033_v46 }
 0x131   : > { %v728_v61 = vmax.f32 %v599_v55, 0.0 }
 0x132   : > { %v1141_v51 = vmax.f32 %v1034_v49, 0.0  ;;  %v953_v52 = vpop.f32.mrf.mxu1  ;;  %v798_v53 = vpack.c.bf16 %v761_v48, %v760_v47 }
 0x133   : > { %v954_v56 = vadd.f32 %v3042_v14, %v953_v52 }
 0x134   : > { %2507 = vmatmul.msk.bf16.gmra.mxu2 %vm840_vm2, %v798_v53  ;;  %v3067_v57 = vpack.c.bf16 %v1141_v51, %v1140_v50 }
 0x135   : > { %v1109_v58 = vmax.f32 %v954_v56, 0.0  ;;  %v683_v59 = vpop.f32.mrf.mxu3 }
 0x136   : > { %v600_v60 = vpop.f32.mrf.mxu0  ;;  %v684_v8 = vadd.f32 %v2862_v3, %v683_v59 }
 0x137   : > { %v601_v62 = vadd.f32 %v2862_v3, %v600_v60  ;;  %v1036_v63 = vpop.f32.mrf.mxu2  ;;  %v3070_v0 = vpack.c.bf16 %v1109_v58, %v1108_v54 }
 0x138   : > { %v1037_v11 = vadd.f32 %v3042_v14, %v1036_v63  ;;  %v762_v17 = vmax.f32 %v684_v8, 0.0 }
 0x139   : > { %v729_v1 = vmax.f32 %v601_v62, 0.0  ;;  %1486 = vmatmul.bf16.gmra.mxu3 %v3070_v0 }
 0x13a   : > { %v956_v2 = vpop.f32.mrf.mxu1  ;;  %v1142_v20 = vmax.f32 %v1037_v11, 0.0 }
 0x13b   : > { %v782_v4 = vpack.c.bf16 %v729_v1, %v728_v61  ;;  %v957_v15 = vadd.f32 %v3042_v14, %v956_v2 }
 0x13d   : > { %v685_v10 = vpop.f32.mrf.mxu3  ;;  %2491 = vmatmul.msk.bf16.gmra.mxu1 %vm840_vm2, %v782_v4  ;;  %v1110_v24 = vmax.f32 %v957_v15, 0.0  ;;  %v2515_v4 = vld [vmem:[%s3803_s5] sm:$0xf] }
 0x13e   : > { %v686_v12 = vadd.f32 %v2862_v3, %v685_v10  ;;  %v603_v13 = vpop.f32.mrf.mxu0  ;;  %v2516_v7 = vor.u32 %v2648_v5, %v2515_v4 }
 0x13f   : > { %v1038_v16 = vpop.f32.mrf.mxu2  ;;  %v604_v25 = vadd.f32 %v2862_v3, %v603_v13 }
 0x140   : > { %v763_v18 = vmax.f32 %v686_v12, 0.0  ;;  %v1039_v19 = vadd.f32 %v3042_v14, %v1038_v16  ;;  %1311 = vmatpush.bf16.msrb.mxu2 %v2516_v7  ;;  %v2667_v12 = vld [vmem:[%s3805_s7 + $0x20] sm:$0xff] }
 0x141   : > { %v730_v31 = vmax.f32 %v604_v25, 0.0  ;;  %1969 = vmatpush.bf16.msrb.mxu0 %v2667_v12 }
 0x142   : > { %v1143_v21 = vmax.f32 %v1039_v19, 0.0  ;;  %v958_v22 = vpop.f32.mrf.mxu1  ;;  %v799_v23 = vpack.c.bf16 %v763_v18, %v762_v17 }
 0x143   : > { %v959_v26 = vadd.f32 %v3042_v14, %v958_v22 }
 0x144   : > { %2508 = vmatmul.msk.bf16.gmra.mxu2 %vm840_vm2, %v799_v23  ;;  %v3091_v27 = vpack.c.bf16 %v1143_v21, %v1142_v20 }
 0x145   : > { %v1111_v28 = vmax.f32 %v959_v26, 0.0  ;;  %v688_v29 = vpop.f32.mrf.mxu3 }
 0x146   : > { %v605_v30 = vpop.f32.mrf.mxu0  ;;  %v689_v39 = vadd.f32 %v2862_v3, %v688_v29 }
 0x147   : > { %v606_v32 = vadd.f32 %v2862_v3, %v605_v30  ;;  %v1041_v34 = vpop.f32.mrf.mxu2  ;;  %v3094_v35 = vpack.c.bf16 %v1111_v28, %v1110_v24 }
 0x148   : > { %v1042_v42 = vadd.f32 %v3042_v14, %v1041_v34  ;;  %v764_v47 = vmax.f32 %v689_v39, 0.0 }
 0x149   : > { %v731_v36 = vmax.f32 %v606_v32, 0.0  ;;  %1491 = vmatmul.bf16.gmra.mxu3 %v3094_v35 }
 0x14a   : > { %v961_v37 = vpop.f32.mrf.mxu1  ;;  %v1144_v50 = vmax.f32 %v1042_v42, 0.0 }
 0x14b   : > { %v783_v38 = vpack.c.bf16 %v731_v36, %v730_v31  ;;  %v962_v45 = vadd.f32 %v3042_v14, %v961_v37 }
 0x14d   : > { %v690_v40 = vpop.f32.mrf.mxu3  ;;  %2492 = vmatmul.msk.bf16.gmra.mxu1 %vm840_vm2, %v783_v38  ;;  %v1112_v54 = vmax.f32 %v962_v45, 0.0  ;;  %v2675_v45 = vld [vmem:[%s3805_s7 + $0x60] sm:$0xff] }
 0x14e   : > { %v691_v43 = vadd.f32 %v2862_v3, %v690_v40  ;;  %v608_v44 = vpop.f32.mrf.mxu0  ;;  %2138 = vmatpush.bf16.msrb.mxu1 %v2675_v45  ;;  %2687 = vmatpush.bf16.msra.mxu3 %v2675_v45 }
 0x14f   : > { %v1043_v46 = vpop.f32.mrf.mxu2  ;;  %v609_v55 = vadd.f32 %v2862_v3, %v608_v44 }
 0x150   : > { %v765_v48 = vmax.f32 %v691_v43, 0.0  ;;  %v1044_v49 = vadd.f32 %v3042_v14, %v1043_v46 }
 0x151   : > { %v732_v62 = vmax.f32 %v609_v55, 0.0 }
 0x152   : > { %v1145_v51 = vmax.f32 %v1044_v49, 0.0  ;;  %v963_v52 = vpop.f32.mrf.mxu1  ;;  %v800_v53 = vpack.c.bf16 %v765_v48, %v764_v47 }
 0x153   : > { %v964_v56 = vadd.f32 %v3042_v14, %v963_v52 }
 0x154   : > { %2509 = vmatmul.msk.bf16.gmra.mxu2 %vm840_vm2, %v800_v53  ;;  %v3109_v58 = vpack.c.bf16 %v1145_v51, %v1144_v50 }
 0x155   : > { %v1113_v59 = vmax.f32 %v964_v56, 0.0  ;;  %v693_v60 = vpop.f32.mrf.mxu3 }
 0x156   : > { %v610_v61 = vpop.f32.mrf.mxu0  ;;  %v694_v10 = vadd.f32 %v2862_v3, %v693_v60 }
 0x157   : > { %v611_v63 = vadd.f32 %v2862_v3, %v610_v61  ;;  %v1046_v1 = vpop.f32.mrf.mxu2  ;;  %v3112_v2 = vpack.c.bf16 %v1113_v59, %v1112_v54 }
 0x158   : > { %v1047_v13 = vadd.f32 %v3042_v14, %v1046_v1  ;;  %v766_v19 = vmax.f32 %v694_v10, 0.0 }
 0x159   : > { %v733_v6 = vmax.f32 %v611_v63, 0.0  ;;  %1496 = vmatmul.bf16.gmra.mxu3 %v3112_v2 }
 0x15a   : > { %v966_v8 = vpop.f32.mrf.mxu1  ;;  %v1146_v22 = vmax.f32 %v1047_v13, 0.0 }
 0x15b   : > { %v784_v9 = vpack.c.bf16 %v733_v6, %v732_v62  ;;  %v967_v17 = vadd.f32 %v3042_v14, %v966_v8 }
 0x15d   : > { %v695_v11 = vpop.f32.mrf.mxu3  ;;  %2493 = vmatmul.msk.bf16.gmra.mxu1 %vm840_vm2, %v784_v9  ;;  %v1114_v26 = vmax.f32 %v967_v17, 0.0 }
 0x15e   : > { %v696_v15 = vadd.f32 %v2862_v3, %v695_v11  ;;  %v613_v16 = vpop.f32.mrf.mxu0 }
 0x15f   : > { %v1048_v18 = vpop.f32.mrf.mxu2  ;;  %v614_v28 = vadd.f32 %v2862_v3, %v613_v16  ;;  %v2666_v16 = vld [vmem:[%s3805_s7 + $0x18] sm:$0xff] }
 0x160   : > { %v767_v20 = vmax.f32 %v696_v15, 0.0  ;;  %v1049_v21 = vadd.f32 %v3042_v14, %v1048_v18  ;;  %1970 = vmatpush.bf16.msrb.mxu0 %v2666_v16 }
 0x161   : > { %v734_v36 = vmax.f32 %v614_v28, 0.0 }
 0x162   : > { %v801_v23 = vpack.c.bf16 %v767_v20, %v766_v19  ;;  %v1147_v24 = vmax.f32 %v1049_v21, 0.0  ;;  %v968_v25 = vpop.f32.mrf.mxu1 }
 0x163   : > { %v969_v29 = vadd.f32 %v3042_v14, %v968_v25 }
 0x164   : > { %2510 = vmatmul.msk.bf16.gmra.mxu2 %vm840_vm2, %v801_v23  ;;  %v3133_v30 = vpack.c.bf16 %v1147_v24, %v1146_v22 }
 0x165   : > { %v1115_v31 = vmax.f32 %v969_v29, 0.0  ;;  %v698_v32 = vpop.f32.mrf.mxu3 }
 0x166   : > { %v615_v34 = vpop.f32.mrf.mxu0  ;;  %v699_v43 = vadd.f32 %v2862_v3, %v698_v32 }
 0x167   : > { %v616_v37 = vadd.f32 %v2862_v3, %v615_v34  ;;  %v1051_v38 = vpop.f32.mrf.mxu2  ;;  %v3136_v39 = vpack.c.bf16 %v1115_v31, %v1114_v26 }
 0x168   : > { %v1052_v46 = vadd.f32 %v3042_v14, %v1051_v38  ;;  %v768_v51 = vmax.f32 %v699_v43, 0.0 }
 0x169   : > { %v735_v40 = vmax.f32 %v616_v37, 0.0  ;;  %1501 = vmatmul.bf16.gmra.mxu3 %v3136_v39 }
 0x16a   : > { %v971_v41 = vpop.f32.mrf.mxu1  ;;  %v1148_v54 = vmax.f32 %v1052_v46, 0.0 }
 0x16b   : > { %v785_v42 = vpack.c.bf16 %v735_v40, %v734_v36  ;;  %v972_v49 = vadd.f32 %v3042_v14, %v971_v41 }
 0x16d   : > { %v700_v44 = vpop.f32.mrf.mxu3  ;;  %2494 = vmatmul.msk.bf16.gmra.mxu1 %vm840_vm2, %v785_v42  ;;  %v1116_v60 = vmax.f32 %v972_v49, 0.0 }
 0x16e   : > { %v701_v47 = vadd.f32 %v2862_v3, %v700_v44  ;;  %v618_v48 = vpop.f32.mrf.mxu0 }
 0x16f   : > { %v1053_v50 = vpop.f32.mrf.mxu2  ;;  %v619_v61 = vadd.f32 %v2862_v3, %v618_v48 }
 0x170   : > { %v769_v52 = vmax.f32 %v701_v47, 0.0  ;;  %v1054_v53 = vadd.f32 %v3042_v14, %v1053_v50  ;;  %v2674_v47 = vld [vmem:[%s3805_s7 + $0x58] sm:$0xff] }
 0x171   : > { %v736_v6 = vmax.f32 %v619_v61, 0.0  ;;  %2688 = vmatpush.bf16.msra.mxu3 %v2674_v47  ;;  %2139 = vmatpush.bf16.msrb.mxu1 %v2674_v47 }
 0x172   : > { %v802_v55 = vpack.c.bf16 %v769_v52, %v768_v51  ;;  %v1149_v56 = vmax.f32 %v1054_v53, 0.0  ;;  %v973_v59 = vpop.f32.mrf.mxu1  ;;  %v2673_v52 = vld [vmem:[%s3805_s7 + $0x50] sm:$0xff] }
 0x173   : > { %v974_v62 = vadd.f32 %v3042_v14, %v973_v59 }
 0x174   : > { %2511 = vmatmul.msk.bf16.gmra.mxu2 %vm840_vm2, %v802_v55  ;;  %v3151_v63 = vpack.c.bf16 %v1149_v56, %v1148_v54 }
 0x175   : > { %v1117_v1 = vmax.f32 %v974_v62, 0.0  ;;  %v703_v4 = vpop.f32.mrf.mxu3  ;;  %2689 = vmatpush.bf16.msra.mxu3 %v2673_v52  ;;  %2140 = vmatpush.bf16.msrb.mxu1 %v2673_v52  ;;  %v2672_v62 = vld [vmem:[%s3805_s7 + $0x48] sm:$0xff] }
 0x176   : > { %v620_v5 = vpop.f32.mrf.mxu0  ;;  %v704_v13 = vadd.f32 %v2862_v3, %v703_v4 }
 0x177   : > { %v621_v7 = vadd.f32 %v2862_v3, %v620_v5  ;;  %v1056_v8 = vpop.f32.mrf.mxu2  ;;  %v3154_v9 = vpack.c.bf16 %v1117_v1, %v1116_v60 }
 0x178   : > { %v1057_v17 = vadd.f32 %v3042_v14, %v1056_v8  ;;  %v770_v22 = vmax.f32 %v704_v13, 0.0 }
 0x179   : > { %v737_v10 = vmax.f32 %v621_v7, 0.0  ;;  %1506 = vmatmul.bf16.gmra.mxu3 %v3154_v9  ;;  %2141 = vmatpush.bf16.msrb.mxu1 %v2672_v62 }
 0x17a   : > { %v976_v11 = vpop.f32.mrf.mxu1  ;;  %v1150_v25 = vmax.f32 %v1057_v17, 0.0  ;;  %2690 = vmatpush.bf16.msra.mxu3 %v2672_v62 }
 0x17b   : > { %v786_v12 = vpack.c.bf16 %v737_v10, %v736_v6  ;;  %v977_v20 = vadd.f32 %v3042_v14, %v976_v11  ;;  %v2671_v11 = vld [vmem:[%s3805_s7 + $0x40] sm:$0xff] }
 0x17d   : > { %v705_v15 = vpop.f32.mrf.mxu3  ;;  %2495 = vmatmul.msk.bf16.gmra.mxu1 %vm840_vm2, %v786_v12  ;;  %v1118_v31 = vmax.f32 %v977_v20, 0.0 }
 0x17e   : > { %v706_v18 = vadd.f32 %v2862_v3, %v705_v15  ;;  %v623_v19 = vpop.f32.mrf.mxu0  ;;  %2142 = vmatpush.bf16.msrb.mxu1 %v2671_v11  ;;  %2691 = vmatpush.bf16.msra.mxu3 %v2671_v11  ;;  %v2664_v11 = vld [vmem:[%s3805_s7 + $0x8] sm:$0xff] }
 0x17f   : > { %v1058_v21 = vpop.f32.mrf.mxu2  ;;  %v624_v32 = vadd.f32 %v2862_v3, %v623_v19 }
 0x180   : > { %v771_v23 = vmax.f32 %v706_v18, 0.0  ;;  %v1059_v24 = vadd.f32 %v3042_v14, %v1058_v21  ;;  %v2665_v21 = vld [vmem:[%s3805_s7 + $0x10] sm:$0xff] }
 0x181   : > { %v738_v40 = vmax.f32 %v624_v32, 0.0  ;;  %1971 = vmatpush.bf16.msrb.mxu0 %v2665_v21 }
 0x182   : > { %v803_v26 = vpack.c.bf16 %v771_v23, %v770_v22  ;;  %v1151_v28 = vmax.f32 %v1059_v24, 0.0  ;;  %v978_v29 = vpop.f32.mrf.mxu1 }
 0x183   : > { %v979_v34 = vadd.f32 %v3042_v14, %v978_v29 }
 0x184   : > { %2512 = vmatmul.msk.bf16.gmra.mxu2 %vm840_vm2, %v803_v26  ;;  %v3169_v36 = vpack.c.bf16 %v1151_v28, %v1150_v25 }
 0x185   : > { %v1119_v37 = vmax.f32 %v979_v34, 0.0  ;;  %1972 = vmatpush.bf16.msrb.mxu0 %v2664_v11 }
 0x186   : > { %v625_v38 = vpop.f32.mrf.mxu0 }
 0x187   : > { %v626_v41 = vadd.f32 %v2862_v3, %v625_v38  ;;  %v1061_v42 = vpop.f32.mrf.mxu2  ;;  %v3172_v43 = vpack.c.bf16 %v1119_v37, %v1118_v31  ;;  %v3217_v31 = vld [vmem:[%s3804_s6] sm:$0x3] }
 0x188   : > { %v1062_v48 = vadd.f32 %v3042_v14, %v1061_v42  ;;  %v3220_v34 = vperm.slane %v3217_v31, 1 }
 0x189   : > { %v739_v44 = vmax.f32 %v626_v41, 0.0  ;;  %1511 = vmatmul.bf16.gmra.mxu3 %v3172_v43 }
 0x18a   : > { %v981_v45 = vpop.f32.mrf.mxu1  ;;  %v1152_v54 = vmax.f32 %v1062_v48, 0.0 }
 0x18b   : > { %v787_v46 = vpack.c.bf16 %v739_v44, %v738_v40  ;;  %v982_v50 = vadd.f32 %v3042_v14, %v981_v45 }
 0x18d   : > { %2496 = vmatmul.msk.bf16.gmra.mxu1 %vm840_vm2, %v787_v46  ;;  %v1120_v59 = vmax.f32 %v982_v50, 0.0 }
 0x18e   : > { %v628_v49 = vpop.f32.mrf.mxu0 }
 0x18f   : > { %v1063_v51 = vpop.f32.mrf.mxu2  ;;  %v629_v60 = vadd.f32 %v2862_v3, %v628_v49 }
 0x190   : > { %v1064_v53 = vadd.f32 %v3042_v14, %v1063_v51 }
 0x191   : > { %v740_v6 = vmax.f32 %v629_v60, 0.0 }
 0x192   : > { %v1153_v55 = vmax.f32 %v1064_v53, 0.0  ;;  %v983_v56 = vpop.f32.mrf.mxu1 }
 0x193   : > { %v984_v61 = vadd.f32 %v3042_v14, %v983_v56 }
 0x194   : > { %1312 = vmatmul.bf16.vlgmr.msrb.gmra.mxu2 %v3051_v33  ;;  %v3191_v1 = vpack.c.bf16 %v1153_v55, %v1152_v54 }
 0x195   : > { %v1121_v4 = vmax.f32 %v984_v61, 0.0 }
 0x196   : > { %v630_v5 = vpop.f32.mrf.mxu0 }
 0x197   : > { %v631_v7 = vadd.f32 %v2862_v3, %v630_v5  ;;  %v1066_v8 = vpop.f32.mrf.mxu2  ;;  %v3194_v10 = vpack.c.bf16 %v1121_v4, %v1120_v59 }
 0x198   : > { %v1067_v15 = vadd.f32 %v3042_v14, %v1066_v8 }
 0x199   : > { %v741_v12 = vmax.f32 %v631_v7, 0.0  ;;  %1516 = vmatmul.bf16.gmra.mxu3 %v3194_v10 }
 0x19a   : > { %v986_v33 = vpop.f32.mrf.mxu1  ;;  %v1154_v18 = vmax.f32 %v1067_v15, 0.0 }
 0x19b   : > { %v788_v13 = vpack.c.bf16 %v741_v12, %v740_v6  ;;  %v987_v3 = vadd.f32 %v3042_v14, %v986_v33 }
 0x19d   : > { %2497 = vmatmul.msk.bf16.gmra.mxu1 %vm840_vm2, %v788_v13  ;;  %v1122_v22 = vmax.f32 %v987_v3, 0.0 }
 0x19f   : > { %v1068_v16 = vpop.f32.mrf.mxu2 }
 0x1a0   : > { %v1069_v17 = vadd.f32 %v3042_v14, %v1068_v16 }
 0x1a2   : > { %v1155_v19 = vmax.f32 %v1069_v17, 0.0  ;;  %v988_v20 = vpop.f32.mrf.mxu1 }
 0x1a3   : > { %v989_v23 = vadd.f32 %v3042_v14, %v988_v20 }
 0x1a4   : > { %1317 = vmatmul.bf16.gmra.mxu2 %v3070_v0  ;;  %v3209_v24 = vpack.c.bf16 %v1155_v19, %v1154_v18 }
 0x1a5   : > { %v1123_v25 = vmax.f32 %v989_v23, 0.0 }
 0x1a7   : > { %v1071_v26 = vpop.f32.mrf.mxu2  ;;  %v3211_v28 = vpack.c.bf16 %v1123_v25, %v1122_v22 }
 0x1a8   : > { %v1072_v0 = vadd.f32 %v3042_v14, %v1071_v26 }
 0x1a9   : > { %1521 = vmatmul.bf16.gmra.mxu3 %v3211_v28 }
 0x1aa   : > { %v991_v29 = vpop.f32.mrf.mxu1  ;;  %v1156_v42 = vmax.f32 %v1072_v0, 0.0 }
 0x1ab   : > { %v992_v37 = vadd.f32 %v3042_v14, %v991_v29 }
 0x1ac   : > { %v1482_v32 = vpop.f32.mrf.mxu3 }
 0x1ad   : > { %v1483_v41 = vadd.f32 %v1482_v32, %v3220_v34  ;;  %v1124_v46 = vmax.f32 %v992_v37, 0.0 }
 0x1af   : > { %v1073_v38 = vpop.f32.mrf.mxu2  ;;  %v1643_v50 = vmax.f32 %v1483_v41, 0.0 }
 0x1b0   : > { %v1074_v40 = vadd.f32 %v3042_v14, %v1073_v38 }
 0x1b2   : > { %v1157_v44 = vmax.f32 %v1074_v40, 0.0  ;;  %v993_v45 = vpop.f32.mrf.mxu1 }
 0x1b3   : > { %v994_v47 = vadd.f32 %v3042_v14, %v993_v45 }
 0x1b4   : > { %1322 = vmatmul.bf16.gmra.mxu2 %v3094_v35  ;;  %v1484_v48 = vpop.f32.mrf.mxu3  ;;  %v3228_v49 = vpack.c.bf16 %v1157_v44, %v1156_v42 }
 0x1b5   : > { %v1125_v51 = vmax.f32 %v994_v47, 0.0  ;;  %v1485_v52 = vadd.f32 %v1484_v48, %v3220_v34 }
 0x1b7   : > { %v1645_v53 = vmax.f32 %v1485_v52, 0.0  ;;  %v1076_v54 = vpop.f32.mrf.mxu2  ;;  %v3231_v55 = vpack.c.bf16 %v1125_v51, %v1124_v46 }
 0x1b8   : > { %v1077_v61 = vadd.f32 %v3042_v14, %v1076_v54 }
 0x1b9   : > { %v1771_v56 = vpack.c.bf16 %v1645_v53, %v1643_v50  ;;  %1526 = vmatmul.bf16.gmra.mxu3 %v3231_v55 }
 0x1ba   : > { %v996_v59 = vpop.f32.mrf.mxu1  ;;  %v1158_v6 = vmax.f32 %v1077_v61, 0.0 }
 0x1bb   : > { %2143 = vmatmul.bf16.vlgmr.msrb.gmra.mxu1 %v1771_v56  ;;  %v997_v35 = vadd.f32 %v3042_v14, %v996_v59 }
 0x1bc   : > { %v1487_v60 = vpop.f32.mrf.mxu3 }
 0x1bd   : > { %v1488_v5 = vadd.f32 %v1487_v60, %v3220_v34  ;;  %v1126_v12 = vmax.f32 %v997_v35, 0.0 }
 0x1bf   : > { %v1078_v62 = vpop.f32.mrf.mxu2  ;;  %v1647_v3 = vmax.f32 %v1488_v5, 0.0 }
 0x1c0   : > { %v1079_v4 = vadd.f32 %v3042_v14, %v1078_v62 }
 0x1c2   : > { %v1159_v7 = vmax.f32 %v1079_v4, 0.0  ;;  %v998_v8 = vpop.f32.mrf.mxu1 }
 0x1c3   : > { %v999_v33 = vadd.f32 %v3042_v14, %v998_v8 }
 0x1c4   : > { %1327 = vmatmul.bf16.gmra.mxu2 %v3112_v2  ;;  %v1489_v13 = vpop.f32.mrf.mxu3  ;;  %v3243_v15 = vpack.c.bf16 %v1159_v7, %v1158_v6 }
 0x1c5   : > { %v1127_v16 = vmax.f32 %v999_v33, 0.0  ;;  %v1490_v17 = vadd.f32 %v1489_v13, %v3220_v34  ;;  %v2663_v13 = vld [vmem:[%s3805_s7] sm:$0xff] }
 0x1c6   : > { %1973 = vmatpush.bf16.msrb.mxu0 %v2663_v13 }
 0x1c7   : > { %v1649_v18 = vmax.f32 %v1490_v17, 0.0  ;;  %v1081_v19 = vpop.f32.mrf.mxu2  ;;  %v3246_v20 = vpack.c.bf16 %v1127_v16, %v1126_v12 }
 0x1c8   : > { %v1082_v2 = vadd.f32 %v3042_v14, %v1081_v19 }
 0x1c9   : > { %1531 = vmatmul.bf16.gmra.mxu3 %v3246_v20  ;;  %v1773_v21 = vpack.c.bf16 %v1649_v18, %v1647_v3 }
 0x1ca   : > { %v1001_v22 = vpop.f32.mrf.mxu1  ;;  %v1160_v0 = vmax.f32 %v1082_v2, 0.0 }
 0x1cb   : > { %2148 = vmatmul.bf16.gmra.mxu1 %v1773_v21  ;;  %v1002_v25 = vadd.f32 %v3042_v14, %v1001_v22 }
 0x1cc   : > { %v1492_v23 = vpop.f32.mrf.mxu3 }
 0x1cd   : > { %v1493_v32 = vadd.f32 %v1492_v23, %v3220_v34  ;;  %v1128_v40 = vmax.f32 %v1002_v25, 0.0 }
 0x1cf   : > { %v1083_v26 = vpop.f32.mrf.mxu2  ;;  %v1651_v45 = vmax.f32 %v1493_v32, 0.0 }
 0x1d0   : > { %v1084_v29 = vadd.f32 %v3042_v14, %v1083_v26 }
 0x1d2   : > { %v1161_v37 = vmax.f32 %v1084_v29, 0.0  ;;  %v1003_v38 = vpop.f32.mrf.mxu1 }
 0x1d3   : > { %v1004_v41 = vadd.f32 %v3042_v14, %v1003_v38 }
 0x1d4   : > { %1332 = vmatmul.bf16.gmra.mxu2 %v3136_v39  ;;  %v1494_v42 = vpop.f32.mrf.mxu3  ;;  %v3255_v44 = vpack.c.bf16 %v1161_v37, %v1160_v0 }
 0x1d5   : > { %v1129_v46 = vmax.f32 %v1004_v41, 0.0  ;;  %v1495_v47 = vadd.f32 %v1494_v42, %v3220_v34 }
 0x1d7   : > { %v1653_v48 = vmax.f32 %v1495_v47, 0.0  ;;  %v1086_v50 = vpop.f32.mrf.mxu2  ;;  %v3258_v51 = vpack.c.bf16 %v1129_v46, %v1128_v40 }
 0x1d8   : > { %v1087_v56 = vadd.f32 %v3042_v14, %v1086_v50 }
 0x1d9   : > { %1536 = vmatmul.bf16.gmra.mxu3 %v3258_v51  ;;  %v1775_v52 = vpack.c.bf16 %v1653_v48, %v1651_v45 }
 0x1da   : > { %v1006_v53 = vpop.f32.mrf.mxu1  ;;  %v1162_v35 = vmax.f32 %v1087_v56, 0.0 }
 0x1db   : > { %2153 = vmatmul.bf16.gmra.mxu1 %v1775_v52  ;;  %v1007_v39 = vadd.f32 %v3042_v14, %v1006_v53 }
 0x1dc   : > { %v1497_v54 = vpop.f32.mrf.mxu3 }
 0x1dd   : > { %v1498_v61 = vadd.f32 %v1497_v54, %v3220_v34  ;;  %v1130_v5 = vmax.f32 %v1007_v39, 0.0 }
 0x1df   : > { %v1088_v59 = vpop.f32.mrf.mxu2  ;;  %v1655_v11 = vmax.f32 %v1498_v61, 0.0 }
 0x1e0   : > { %v1089_v60 = vadd.f32 %v3042_v14, %v1088_v59 }
 0x1e2   : > { %v1163_v62 = vmax.f32 %v1089_v60, 0.0  ;;  %v1008_v4 = vpop.f32.mrf.mxu1 }
 0x1e3   : > { %v1009_v6 = vadd.f32 %v3042_v14, %v1008_v4 }
 0x1e4   : > { %1337 = vmatmul.bf16.gmra.mxu2 %v3154_v9  ;;  %v1499_v7 = vpop.f32.mrf.mxu3  ;;  %v3267_v8 = vpack.c.bf16 %v1163_v62, %v1162_v35 }
 0x1e5   : > { %v1131_v12 = vmax.f32 %v1009_v6, 0.0  ;;  %v1500_v33 = vadd.f32 %v1499_v7, %v3220_v34 }
 0x1e7   : > { %v1657_v3 = vmax.f32 %v1500_v33, 0.0  ;;  %v1091_v16 = vpop.f32.mrf.mxu2  ;;  %v3273_v17 = vpack.c.bf16 %v1131_v12, %v1130_v5 }
 0x1e8   : > { %v1092_v21 = vadd.f32 %v3042_v14, %v1091_v16 }
 0x1e9   : > { %1541 = vmatmul.bf16.gmra.mxu3 %v3273_v17  ;;  %v1777_v18 = vpack.c.bf16 %v1657_v3, %v1655_v11 }
 0x1ea   : > { %v1011_v9 = vpop.f32.mrf.mxu1  ;;  %v1164_v26 = vmax.f32 %v1092_v21, 0.0 }
 0x1eb   : > { %2158 = vmatmul.bf16.gmra.mxu1 %v1777_v18  ;;  %v1012_v22 = vadd.f32 %v3042_v14, %v1011_v9 }
 0x1ec   : > { %v1502_v19 = vpop.f32.mrf.mxu3 }
 0x1ed   : > { %v1503_v25 = vadd.f32 %v1502_v19, %v3220_v34  ;;  %v1132_v0 = vmax.f32 %v1012_v22, 0.0 }
 0x1ef   : > { %v1093_v23 = vpop.f32.mrf.mxu2  ;;  %v1659_v41 = vmax.f32 %v1503_v25, 0.0 }
 0x1f0   : > { %v1094_v2 = vadd.f32 %v3042_v14, %v1093_v23 }
 0x1f2   : > { %v1165_v29 = vmax.f32 %v1094_v2, 0.0  ;;  %v1013_v32 = vpop.f32.mrf.mxu1 }
 0x1f3   : > { %v1014_v37 = vadd.f32 %v3042_v14, %v1013_v32 }
 0x1f4   : > { %1342 = vmatmul.bf16.gmra.mxu2 %v3172_v43  ;;  %v1504_v38 = vpop.f32.mrf.mxu3  ;;  %v3282_v40 = vpack.c.bf16 %v1165_v29, %v1164_v26 }
 0x1f5   : > { %v1133_v42 = vmax.f32 %v1014_v37, 0.0  ;;  %v1505_v45 = vadd.f32 %v1504_v38, %v3220_v34 }
 0x1f7   : > { %v1661_v46 = vmax.f32 %v1505_v45, 0.0  ;;  %v1096_v47 = vpop.f32.mrf.mxu2  ;;  %v3285_v48 = vpack.c.bf16 %v1133_v42, %v1132_v0 }
 0x1f8   : > { %v1097_v54 = vadd.f32 %v3042_v14, %v1096_v47 }
 0x1f9   : > { %1546 = vmatmul.bf16.gmra.mxu3 %v3285_v48  ;;  %v1779_v50 = vpack.c.bf16 %v1661_v46, %v1659_v41 }
 0x1fa   : > { %v1016_v52 = vpop.f32.mrf.mxu1  ;;  %v1166_v60 = vmax.f32 %v1097_v54, 0.0 }
 0x1fb   : > { %2163 = vmatmul.bf16.gmra.mxu1 %v1779_v50  ;;  %v1017_v43 = vadd.f32 %v3042_v14, %v1016_v52  ;;  %v3313_v52 = vperm.slane %v3217_v31, 0 }
 0x1fc   : > { %v1507_v53 = vpop.f32.mrf.mxu3 }
 0x1fd   : > { %v1508_v59 = vadd.f32 %v1507_v53, %v3220_v34  ;;  %v1134_v62 = vmax.f32 %v1017_v43, 0.0 }
 0x1ff   : > { %v1098_v56 = vpop.f32.mrf.mxu2  ;;  %v1663_v7 = vmax.f32 %v1508_v59, 0.0 }
 0x200   : > { %v1099_v39 = vadd.f32 %v3042_v14, %v1098_v56 }
 0x202   : > { %v1167_v61 = vmax.f32 %v1099_v39, 0.0  ;;  %v1018_v35 = vpop.f32.mrf.mxu1 }
 0x203   : > { %v1019_v4 = vadd.f32 %v3042_v14, %v1018_v35 }
 0x204   : > { %1347 = vmatmul.bf16.gmra.mxu2 %v3194_v10  ;;  %v1509_v5 = vpop.f32.mrf.mxu3  ;;  %v3294_v6 = vpack.c.bf16 %v1167_v61, %v1166_v60 }
 0x205   : > { %v1135_v11 = vmax.f32 %v1019_v4, 0.0  ;;  %v1510_v12 = vadd.f32 %v1509_v5, %v3220_v34 }
 0x207   : > { %v1665_v33 = vmax.f32 %v1510_v12, 0.0  ;;  %v1101_v13 = vpop.f32.mrf.mxu2  ;;  %v3297_v3 = vpack.c.bf16 %v1135_v11, %v1134_v62 }
 0x208   : > { %v1102_v19 = vadd.f32 %v3042_v14, %v1101_v13 }
 0x209   : > { %1551 = vmatmul.bf16.gmra.mxu3 %v3297_v3  ;;  %v1781_v16 = vpack.c.bf16 %v1665_v33, %v1663_v7 }
 0x20a   : > { %v1021_v18 = vpop.f32.mrf.mxu1  ;;  %v1168_v2 = vmax.f32 %v1102_v19, 0.0 }
 0x20b   : > { %2168 = vmatmul.bf16.gmra.mxu1 %v1781_v16  ;;  %v1022_v10 = vadd.f32 %v3042_v14, %v1021_v18 }
 0x20c   : > { %v1512_v9 = vpop.f32.mrf.mxu3 }
 0x20d   : > { %v1513_v23 = vadd.f32 %v1512_v9, %v3220_v34  ;;  %v1136_v29 = vmax.f32 %v1022_v10, 0.0 }
 0x20f   : > { %v1103_v21 = vpop.f32.mrf.mxu2  ;;  %v1667_v38 = vmax.f32 %v1513_v23, 0.0 }
 0x210   : > { %v1104_v22 = vadd.f32 %v3042_v14, %v1103_v21 }
 0x212   : > { %v1169_v25 = vmax.f32 %v1104_v22, 0.0  ;;  %v1023_v26 = vpop.f32.mrf.mxu1 }
 0x213   : > { %v1024_v32 = vadd.f32 %v3042_v14, %v1023_v26 }
 0x214   : > { %1352 = vmatmul.bf16.gmra.mxu2 %v3211_v28  ;;  %v1514_v0 = vpop.f32.mrf.mxu3  ;;  %v3306_v37 = vpack.c.bf16 %v1169_v25, %v1168_v2 }
 0x215   : > { %v1137_v41 = vmax.f32 %v1024_v32, 0.0  ;;  %v1515_v42 = vadd.f32 %v1514_v0, %v3220_v34 }
 0x217   : > { %v1669_v45 = vmax.f32 %v1515_v42, 0.0  ;;  %v1313_v46 = vpop.f32.mrf.mxu2  ;;  %v3309_v47 = vpack.c.bf16 %v1137_v41, %v1136_v29 }
 0x218   : > { %v1314_v54 = vadd.f32 %v1313_v46, %v3313_v52 }
 0x219   : > { %1556 = vmatmul.bf16.gmra.mxu3 %v3309_v47  ;;  %v1783_v50 = vpack.c.bf16 %v1669_v45, %v1667_v38 }
 0x21a   : > { %v1026_v53 = vpop.f32.mrf.mxu1  ;;  %v1642_v60 = vmax.f32 %v1314_v54, 0.0 }
 0x21b   : > { %2173 = vmatmul.bf16.gmra.mxu1 %v1783_v50  ;;  %v1027_v43 = vadd.f32 %v3042_v14, %v1026_v53 }
 0x21c   : > { %v1517_v28 = vpop.f32.mrf.mxu3 }
 0x21d   : > { %v1518_v59 = vadd.f32 %v1517_v28, %v3220_v34  ;;  %v1138_v62 = vmax.f32 %v1027_v43, 0.0 }
 0x21f   : > { %v1315_v56 = vpop.f32.mrf.mxu2  ;;  %v1671_v7 = vmax.f32 %v1518_v59, 0.0 }
 0x220   : > { %v1316_v39 = vadd.f32 %v1315_v56, %v3313_v52 }
 0x222   : > { %v1644_v61 = vmax.f32 %v1316_v39, 0.0  ;;  %v1028_v35 = vpop.f32.mrf.mxu1 }
 0x223   : > { %v1029_v4 = vadd.f32 %v3042_v14, %v1028_v35 }
 0x224   : > { %v1770_v31 = vpack.c.bf16 %v1644_v61, %v1642_v60  ;;  %1357 = vmatmul.bf16.gmra.mxu2 %v3231_v55  ;;  %v1519_v5 = vpop.f32.mrf.mxu3 }
 0x225   : > { %v1139_v11 = vmax.f32 %v1029_v4, 0.0  ;;  %v1520_v12 = vadd.f32 %v1519_v5, %v3220_v34 }
 0x226   : > { %1974 = vmatmul.bf16.vlgmr.msrb.gmra.mxu0 %v1770_v31 }
 0x227   : > { %v1673_v33 = vmax.f32 %v1520_v12, 0.0  ;;  %v1318_v13 = vpop.f32.mrf.mxu2  ;;  %v3322_v16 = vpack.c.bf16 %v1139_v11, %v1138_v62 }
 0x228   : > { %v1319_v14 = vadd.f32 %v1318_v13, %v3313_v52 }
 0x229   : > { %1561 = vmatmul.bf16.gmra.mxu3 %v3322_v16  ;;  %v1785_v18 = vpack.c.bf16 %v1673_v33, %v1671_v7 }
 0x22a   : > { %v1646_v21 = vmax.f32 %v1319_v14, 0.0 }
 0x22b   : > { %2178 = vmatmul.bf16.gmra.mxu1 %v1785_v18 }
 0x22c   : > { %v1522_v9 = vpop.f32.mrf.mxu3 }
 0x22d   : > { %v1523_v10 = vadd.f32 %v1522_v9, %v3220_v34 }
 0x22f   : > { %v1320_v19 = vpop.f32.mrf.mxu2  ;;  %v1675_v25 = vmax.f32 %v1523_v10, 0.0 }
 0x230   : > { %v1321_v55 = vadd.f32 %v1320_v19, %v3313_v52 }
 0x232   : > { %v1648_v22 = vmax.f32 %v1321_v55, 0.0 }
 0x234   : > { %1362 = vmatmul.bf16.gmra.mxu2 %v3246_v20  ;;  %v1524_v23 = vpop.f32.mrf.mxu3  ;;  %v1772_v2 = vpack.c.bf16 %v1648_v22, %v1646_v21 }
 0x235   : > { %v1525_v26 = vadd.f32 %v1524_v23, %v3220_v34 }
 0x236   : > { %1979 = vmatmul.bf16.gmra.mxu0 %v1772_v2 }
 0x237   : > { %v1677_v29 = vmax.f32 %v1525_v26, 0.0  ;;  %v1323_v32 = vpop.f32.mrf.mxu2 }
 0x238   : > { %v3330_v0 = vpop.f32.mrf.mxu1  ;;  %v1324_v42 = vadd.f32 %v1323_v32, %v3313_v52 }
 0x239   : > { %1566 = vmatmul.bf16.gmra.mxu3 %v3067_v57  ;;  %v1787_v38 = vpack.c.bf16 %v1677_v29, %v1675_v25 }
 0x23a   : > { %v1650_v53 = vmax.f32 %v1324_v42, 0.0 }
 0x23b   : > { %2183 = vmatmul.bf16.gmra.mxu1 %v1787_v38 }
 0x23c   : > { %v1527_v41 = vpop.f32.mrf.mxu3 }
 0x23d   : > { %v1528_v50 = vadd.f32 %v1527_v41, %v3220_v34 }
 0x23f   : > { %v1325_v45 = vpop.f32.mrf.mxu2  ;;  %v1679_v56 = vmax.f32 %v1528_v50, 0.0 }
 0x240   : > { %v1326_v20 = vadd.f32 %v1325_v45, %v3313_v52  ;;  %v3335_v46 = vpop.f32.mrf.mxu1 }
 0x242   : > { %v1652_v28 = vmax.f32 %v1326_v20, 0.0 }
 0x244   : > { %1367 = vmatmul.bf16.gmra.mxu2 %v3258_v51  ;;  %v1529_v54 = vpop.f32.mrf.mxu3  ;;  %v1774_v43 = vpack.c.bf16 %v1652_v28, %v1650_v53 }
 0x245   : > { %v1530_v39 = vadd.f32 %v1529_v54, %v3220_v34 }
 0x246   : > { %1984 = vmatmul.bf16.gmra.mxu0 %v1774_v43 }
 0x247   : > { %v1681_v59 = vmax.f32 %v1530_v39, 0.0  ;;  %v1328_v60 = vpop.f32.mrf.mxu2 }
 0x248   : > { %v3340_v61 = vpop.f32.mrf.mxu1  ;;  %v1329_v4 = vadd.f32 %v1328_v60, %v3313_v52 }
 0x249   : > { %1571 = vmatmul.bf16.gmra.mxu3 %v3091_v27  ;;  %v1789_v35 = vpack.c.bf16 %v1681_v59, %v1679_v56 }
 0x24a   : > { %v1654_v11 = vmax.f32 %v1329_v4, 0.0 }
 0x24b   : > { %2188 = vmatmul.bf16.gmra.mxu1 %v1789_v35 }
 0x24c   : > { %v1532_v62 = vpop.f32.mrf.mxu3 }
 0x24d   : > { %v1533_v7 = vadd.f32 %v1532_v62, %v3220_v34 }
 0x24f   : > { %v1330_v31 = vpop.f32.mrf.mxu2  ;;  %v1683_v18 = vmax.f32 %v1533_v7, 0.0 }
 0x250   : > { %v1331_v51 = vadd.f32 %v1330_v31, %v3313_v52  ;;  %v3345_v5 = vpop.f32.mrf.mxu1 }
 0x252   : > { %v1656_v12 = vmax.f32 %v1331_v51, 0.0 }
 0x254   : > { %1372 = vmatmul.bf16.gmra.mxu2 %v3273_v17  ;;  %v1534_v33 = vpop.f32.mrf.mxu3  ;;  %v1776_v13 = vpack.c.bf16 %v1656_v12, %v1654_v11 }
 0x255   : > { %v1535_v9 = vadd.f32 %v1534_v33, %v3220_v34 }
 0x256   : > { %1989 = vmatmul.bf16.gmra.mxu0 %v1776_v13 }
 0x257   : > { %v1685_v14 = vmax.f32 %v1535_v9, 0.0  ;;  %v1333_v19 = vpop.f32.mrf.mxu2 }
 0x258   : > { %v3350_v55 = vpop.f32.mrf.mxu1  ;;  %v1334_v22 = vadd.f32 %v1333_v19, %v3313_v52 }
 0x259   : > { %1576 = vmatmul.bf16.gmra.mxu3 %v3109_v58  ;;  %v1791_v10 = vpack.c.bf16 %v1685_v14, %v1683_v18 }
 0x25a   : > { %v1658_v26 = vmax.f32 %v1334_v22, 0.0 }
 0x25b   : > { %2193 = vmatmul.bf16.gmra.mxu1 %v1791_v10 }
 0x25c   : > { %v1537_v21 = vpop.f32.mrf.mxu3 }
 0x25d   : > { %v1538_v25 = vadd.f32 %v1537_v21, %v3220_v34 }
 0x25f   : > { %v1335_v23 = vpop.f32.mrf.mxu2  ;;  %v1687_v41 = vmax.f32 %v1538_v25, 0.0 }
 0x260   : > { %v1336_v17 = vadd.f32 %v1335_v23, %v3313_v52  ;;  %v3355_v2 = vpop.f32.mrf.mxu1 }
 0x262   : > { %v1660_v29 = vmax.f32 %v1336_v17, 0.0 }
 0x264   : > { %1377 = vmatmul.bf16.gmra.mxu2 %v3285_v48  ;;  %v1539_v32 = vpop.f32.mrf.mxu3  ;;  %v1778_v38 = vpack.c.bf16 %v1660_v29, %v1658_v26 }
 0x265   : > { %v1540_v42 = vadd.f32 %v1539_v32, %v3220_v34 }
 0x266   : > { %1994 = vmatmul.bf16.gmra.mxu0 %v1778_v38 }
 0x267   : > { %v1689_v45 = vmax.f32 %v1540_v42, 0.0  ;;  %v1338_v20 = vpop.f32.mrf.mxu2 }
 0x268   : > { %v3360_v50 = vpop.f32.mrf.mxu1  ;;  %v1339_v54 = vadd.f32 %v1338_v20, %v3313_v52 }
 0x269   : > { %1581 = vmatmul.bf16.gmra.mxu3 %v3133_v30  ;;  %v1793_v53 = vpack.c.bf16 %v1689_v45, %v1687_v41 }
 0x26a   : > { %v1662_v59 = vmax.f32 %v1339_v54, 0.0 }
 0x26b   : > { %2198 = vmatmul.bf16.gmra.mxu1 %v1793_v53 }
 0x26c   : > { %v1542_v28 = vpop.f32.mrf.mxu3 }
 0x26d   : > { %v1543_v39 = vadd.f32 %v1542_v28, %v3220_v34 }
 0x26f   : > { %v1340_v43 = vpop.f32.mrf.mxu2  ;;  %v1691_v4 = vmax.f32 %v1543_v39, 0.0 }
 0x270   : > { %v1341_v48 = vadd.f32 %v1340_v43, %v3313_v52  ;;  %v3365_v56 = vpop.f32.mrf.mxu1 }
 0x272   : > { %v1664_v60 = vmax.f32 %v1341_v48, 0.0 }
 0x274   : > { %1382 = vmatmul.bf16.gmra.mxu2 %v3297_v3  ;;  %v1544_v35 = vpop.f32.mrf.mxu3  ;;  %v1780_v62 = vpack.c.bf16 %v1664_v60, %v1662_v59 }
 0x275   : > { %v1545_v31 = vadd.f32 %v1544_v35, %v3220_v34 }
 0x276   : > { %1999 = vmatmul.bf16.gmra.mxu0 %v1780_v62 }
 0x277   : > { %v1693_v51 = vmax.f32 %v1545_v31, 0.0  ;;  %v1343_v7 = vpop.f32.mrf.mxu2 }
 0x278   : > { %v3370_v11 = vpop.f32.mrf.mxu1  ;;  %v1344_v13 = vadd.f32 %v1343_v7, %v3313_v52 }
 0x279   : > { %1586 = vmatmul.bf16.gmra.mxu3 %v3151_v63  ;;  %v1795_v12 = vpack.c.bf16 %v1693_v51, %v1691_v4  ;;  %v3396_v51 = vld [vmem:[%s3806_s8] ss:$0 sm:$0xff] }
 0x27a   : > { %v1666_v14 = vmax.f32 %v1344_v13, 0.0 }
 0x27b   : > { %2203 = vmatmul.bf16.gmra.mxu1 %v1795_v12 }
 0x27c   : > { %v1547_v33 = vpop.f32.mrf.mxu3 }
 0x27d   : > { %v1548_v9 = vadd.f32 %v1547_v33, %v3220_v34 }
 0x27f   : > { %v1345_v18 = vpop.f32.mrf.mxu2  ;;  %v1695_v23 = vmax.f32 %v1548_v9, 0.0 }
 0x280   : > { %v1346_v3 = vadd.f32 %v1345_v18, %v3313_v52  ;;  %v3376_v10 = vpop.f32.mrf.mxu1 }
 0x282   : > { %v1668_v19 = vmax.f32 %v1346_v3, 0.0 }
 0x284   : > { %1387 = vmatmul.bf16.gmra.mxu2 %v3309_v47  ;;  %v1549_v21 = vpop.f32.mrf.mxu3  ;;  %v1782_v22 = vpack.c.bf16 %v1668_v19, %v1666_v14 }
 0x285   : > { %v1550_v17 = vadd.f32 %v1549_v21, %v3220_v34 }
 0x286   : > { %2004 = vmatmul.bf16.gmra.mxu0 %v1782_v22 }
 0x287   : > { %v1697_v25 = vmax.f32 %v1550_v17, 0.0  ;;  %v1348_v26 = vpop.f32.mrf.mxu2 }
 0x288   : > { %v3381_v38 = vpop.f32.mrf.mxu1  ;;  %v1349_v41 = vadd.f32 %v1348_v26, %v3313_v52 }
 0x289   : > { %1591 = vmatmul.bf16.gmra.mxu3 %v3169_v36  ;;  %v1797_v29 = vpack.c.bf16 %v1697_v25, %v1695_v23 }
 0x28a   : > { %v1670_v20 = vmax.f32 %v1349_v41, 0.0 }
 0x28b   : > { %2208 = vmatmul.bf16.gmra.mxu1 %v1797_v29 }
 0x28c   : > { %v1552_v32 = vpop.f32.mrf.mxu3 }
 0x28d   : > { %v1553_v45 = vadd.f32 %v1552_v32, %v3220_v34 }
 0x28f   : > { %v1350_v42 = vpop.f32.mrf.mxu2  ;;  %v1699_v43 = vmax.f32 %v1553_v45, 0.0 }
 0x290   : > { %v1351_v47 = vadd.f32 %v1350_v42, %v3313_v52  ;;  %v3388_v39 = vpop.f32.mrf.mxu1 }
 0x292   : > { %v1672_v53 = vmax.f32 %v1351_v47, 0.0 }
 0x294   : > { %1392 = vmatmul.bf16.gmra.mxu2 %v3322_v16  ;;  %v1554_v28 = vpop.f32.mrf.mxu3  ;;  %v1784_v54 = vpack.c.bf16 %v1672_v53, %v1670_v20 }
 0x295   : > { %v1555_v48 = vadd.f32 %v1554_v28, %v3220_v34 }
 0x296   : > { %2009 = vmatmul.bf16.gmra.mxu0 %v1784_v54 }
 0x297   : > { %v1701_v59 = vmax.f32 %v1555_v48, 0.0  ;;  %v1353_v60 = vpop.f32.mrf.mxu2 }
 0x298   : > { %v1354_v4 = vadd.f32 %v1353_v60, %v3313_v52  ;;  %v3398_v7 = vpop.f32.mrf.mxu1 }
 0x299   : > { %1596 = vmatmul.bf16.gmra.mxu3 %v3191_v1  ;;  %v1799_v35 = vpack.c.bf16 %v1701_v59, %v1699_v43 }
 0x29a   : > { %v1674_v33 = vmax.f32 %v1354_v4, 0.0 }
 0x29b   : > { %2213 = vmatmul.bf16.gmra.mxu1 %v1799_v35 }
 0x29c   : > { %v1557_v62 = vpop.f32.mrf.mxu3 }
 0x29d   : > { %v1558_v12 = vadd.f32 %v1557_v62, %v3220_v34 }
 0x29f   : > { %v1355_v31 = vpop.f32.mrf.mxu2  ;;  %v1703_v19 = vmax.f32 %v1558_v12, 0.0 }
 0x2a0   : > { %v1356_v16 = vadd.f32 %v1355_v31, %v3313_v52  ;;  %v3415_v25 = vpop.f32.mrf.mxu1 }
 0x2a2   : > { %v1676_v13 = vmax.f32 %v1356_v16, 0.0 }
 0x2a3   : > { %v1975_v18 = vpop.f32.mrf.mxu0 }
 0x2a4   : > { %v1976_v3 = vadd.f32 %v3396_v51, %v1975_v18  ;;  %1397 = vmatmul.bf16.gmra.mxu2 %v3067_v57  ;;  %v1559_v9 = vpop.f32.mrf.mxu3  ;;  %v1786_v14 = vpack.c.bf16 %v1676_v13, %v1674_v33 }
 0x2a5   : > { %v1560_v21 = vadd.f32 %v1559_v9, %v3220_v34 }
 0x2a6   : > { %v2145_v22 = vadd.f32 %v3330_v0, %v1976_v3  ;;  %2014 = vmatmul.bf16.gmra.mxu0 %v1786_v14 }
 0x2a7   : > { %v1705_v23 = vmax.f32 %v1560_v21, 0.0  ;;  %v1358_v17 = vpop.f32.mrf.mxu2 }
 0x2a8   : > { %2304 = vst.msk [vmem:[%s3408_s27] sm:$0xff] %vm840_vm2, %v2145_v22  ;;  %v1359_v41 = vadd.f32 %v1358_v17, %v3313_v52  ;;  %v3426_v59 = vpop.f32.mrf.mxu1 }
 0x2a9   : > { %1601 = vmatmul.bf16.gmra.mxu3 %v3209_v24  ;;  %v1801_v57 = vpack.c.bf16 %v1705_v23, %v1703_v19 }
 0x2aa   : > { %v1678_v20 = vmax.f32 %v1359_v41, 0.0 }
 0x2ab   : > { %v1977_v26 = vpop.f32.mrf.mxu0  ;;  %2218 = vmatmul.bf16.gmra.mxu1 %v1801_v57 }
 0x2ac   : > { %v1978_v29 = vadd.f32 %v3396_v51, %v1977_v26  ;;  %v1562_v32 = vpop.f32.mrf.mxu3 }
 0x2ad   : > { %v1563_v45 = vadd.f32 %v1562_v32, %v3220_v34 }
 0x2ae   : > { %v2147_v42 = vadd.f32 %v3335_v46, %v1978_v29 }
 0x2af   : > { %v1360_v0 = vpop.f32.mrf.mxu2  ;;  %v1707_v46 = vmax.f32 %v1563_v45, 0.0 }
 0x2b0   : > { %2305 = vst.msk [vmem:[%s3408_s27 + $0x8] sm:$0xff] %vm840_vm2, %v2147_v42  ;;  %v1361_v47 = vadd.f32 %v1360_v0, %v3313_v52  ;;  %v3436_v18 = vpop.f32.mrf.mxu1 }
 0x2b2   : > { %v1680_v53 = vmax.f32 %v1361_v47, 0.0 }
 0x2b3   : > { %v1980_v28 = vpop.f32.mrf.mxu0 }
 0x2b4   : > { %v1981_v54 = vadd.f32 %v3396_v51, %v1980_v28  ;;  %1402 = vmatmul.bf16.gmra.mxu2 %v3091_v27  ;;  %v1564_v43 = vpop.f32.mrf.mxu3  ;;  %v1788_v48 = vpack.c.bf16 %v1680_v53, %v1678_v20 }
 0x2b5   : > { %v1565_v60 = vadd.f32 %v1564_v43, %v3220_v34 }
 0x2b6   : > { %v2150_v35 = vadd.f32 %v3340_v61, %v1981_v54  ;;  %2019 = vmatmul.bf16.gmra.mxu0 %v1788_v48 }
 0x2b7   : > { %v1709_v62 = vmax.f32 %v1565_v60, 0.0  ;;  %v1363_v4 = vpop.f32.mrf.mxu2 }
 0x2b8   : > { %2306 = vst.msk [vmem:[%s3408_s27 + $0x10] sm:$0xff] %vm840_vm2, %v2150_v35  ;;  %v1364_v33 = vadd.f32 %v1363_v4, %v3313_v52  ;;  %v3448_v41 = vpop.f32.mrf.mxu1 }
 0x2b9   : > { %1606 = vmatmul.bf16.gmra.mxu3 %v3228_v49  ;;  %v1803_v31 = vpack.c.bf16 %v1709_v62, %v1707_v46 }
 0x2ba   : > { %v1682_v9 = vmax.f32 %v1364_v33, 0.0 }
 0x2bb   : > { %v1982_v16 = vpop.f32.mrf.mxu0  ;;  %2223 = vmatmul.bf16.gmra.mxu1 %v1803_v31 }
 0x2bc   : > { %v1983_v27 = vadd.f32 %v3396_v51, %v1982_v16  ;;  %v1567_v12 = vpop.f32.mrf.mxu3 }
 0x2bd   : > { %v1568_v19 = vadd.f32 %v1567_v12, %v3220_v34 }
 0x2be   : > { %v2152_v13 = vadd.f32 %v3345_v5, %v1983_v27 }
 0x2bf   : > { %v1365_v61 = vpop.f32.mrf.mxu2  ;;  %v1711_v26 = vmax.f32 %v1568_v19, 0.0 }
 0x2c0   : > { %2307 = vst.msk [vmem:[%s3408_s27 + $0x18] sm:$0xff] %vm840_vm2, %v2152_v13  ;;  %v1366_v3 = vadd.f32 %v1365_v61, %v3313_v52  ;;  %v3457_v43 = vpop.f32.mrf.mxu1 }
 0x2c2   : > { %v1684_v14 = vmax.f32 %v1366_v3, 0.0 }
 0x2c3   : > { %v1985_v21 = vpop.f32.mrf.mxu0 }
 0x2c4   : > { %v1986_v22 = vadd.f32 %v3396_v51, %v1985_v21  ;;  %1407 = vmatmul.bf16.gmra.mxu2 %v3109_v58  ;;  %v1569_v23 = vpop.f32.mrf.mxu3  ;;  %v1790_v17 = vpack.c.bf16 %v1684_v14, %v1682_v9 }
 0x2c5   : > { %v1570_v5 = vadd.f32 %v1569_v23, %v3220_v34 }
 0x2c6   : > { %v2155_v57 = vadd.f32 %v3350_v55, %v1986_v22  ;;  %2024 = vmatmul.bf16.gmra.mxu0 %v1790_v17 }
 0x2c7   : > { %v1713_v29 = vmax.f32 %v1570_v5, 0.0  ;;  %v1368_v32 = vpop.f32.mrf.mxu2 }
 0x2c8   : > { %2308 = vst.msk [vmem:[%s3408_s27 + $0x20] sm:$0xff] %vm840_vm2, %v2155_v57  ;;  %v1369_v45 = vadd.f32 %v1368_v32, %v3313_v52  ;;  %v3468_v61 = vpop.f32.mrf.mxu1 }
 0x2c9   : > { %1611 = vmatmul.bf16.gmra.mxu3 %v3243_v15  ;;  %v1805_v42 = vpack.c.bf16 %v1713_v29, %v1711_v26 }
 0x2ca   : > { %v1686_v28 = vmax.f32 %v1369_v45, 0.0 }
 0x2cb   : > { %v1987_v0 = vpop.f32.mrf.mxu0  ;;  %2228 = vmatmul.bf16.gmra.mxu1 %v1805_v42 }
 0x2cc   : > { %v1988_v58 = vadd.f32 %v3396_v51, %v1987_v0  ;;  %v1572_v47 = vpop.f32.mrf.mxu3 }
 0x2cd   : > { %v1573_v48 = vadd.f32 %v1572_v47, %v3220_v34 }
 0x2ce   : > { %v2157_v55 = vadd.f32 %v3355_v2, %v1988_v58 }
 0x2cf   : > { %v1370_v20 = vpop.f32.mrf.mxu2  ;;  %v1715_v31 = vmax.f32 %v1573_v48, 0.0 }
 0x2d0   : > { %2309 = vst.msk [vmem:[%s3408_s27 + $0x28] sm:$0xff] %vm840_vm2, %v2157_v55  ;;  %v1371_v53 = vadd.f32 %v1370_v20, %v3313_v52  ;;  %v3480_v29 = vpop.f32.mrf.mxu1 }
 0x2d2   : > { %v1688_v54 = vmax.f32 %v1371_v53, 0.0 }
 0x2d3   : > { %v1990_v46 = vpop.f32.mrf.mxu0 }
 0x2d4   : > { %v1991_v60 = vadd.f32 %v3396_v51, %v1990_v46  ;;  %1412 = vmatmul.bf16.gmra.mxu2 %v3133_v30  ;;  %v1574_v35 = vpop.f32.mrf.mxu3  ;;  %v1792_v62 = vpack.c.bf16 %v1688_v54, %v1686_v28 }
 0x2d5   : > { %v1575_v2 = vadd.f32 %v1574_v35, %v3220_v34 }
 0x2d6   : > { %v2160_v4 = vadd.f32 %v3360_v50, %v1991_v60  ;;  %2029 = vmatmul.bf16.gmra.mxu0 %v1792_v62 }
 0x2d7   : > { %v1717_v16 = vmax.f32 %v1575_v2, 0.0  ;;  %v1373_v27 = vpop.f32.mrf.mxu2 }
 0x2d8   : > { %2310 = vst.msk [vmem:[%s3408_s27 + $0x30] sm:$0xff] %vm840_vm2, %v2160_v4  ;;  %v1374_v3 = vadd.f32 %v1373_v27, %v3313_v52  ;;  %v3491_v28 = vpop.f32.mrf.mxu1 }
 0x2d9   : > { %1616 = vmatmul.bf16.gmra.mxu3 %v3255_v44  ;;  %v1807_v12 = vpack.c.bf16 %v1717_v16, %v1715_v31 }
 0x2da   : > { %v1690_v19 = vmax.f32 %v1374_v3, 0.0 }
 0x2db   : > { %v1992_v33 = vpop.f32.mrf.mxu0  ;;  %2233 = vmatmul.bf16.gmra.mxu1 %v1807_v12 }
 0x2dc   : > { %v1993_v30 = vadd.f32 %v3396_v51, %v1992_v33  ;;  %v1577_v13 = vpop.f32.mrf.mxu3 }
 0x2dd   : > { %v1578_v22 = vadd.f32 %v1577_v13, %v3220_v34 }
 0x2de   : > { %v2162_v50 = vadd.f32 %v3365_v56, %v1993_v30 }
 0x2df   : > { %v1375_v9 = vpop.f32.mrf.mxu2  ;;  %v1719_v32 = vmax.f32 %v1578_v22, 0.0 }
 0x2e0   : > { %2311 = vst.msk [vmem:[%s3408_s27 + $0x38] sm:$0xff] %vm840_vm2, %v2162_v50  ;;  %v1376_v14 = vadd.f32 %v1375_v9, %v3313_v52  ;;  %v3501_v33 = vpop.f32.mrf.mxu1 }
 0x2e2   : > { %v1692_v21 = vmax.f32 %v1376_v14, 0.0 }
 0x2e3   : > { %v1995_v23 = vpop.f32.mrf.mxu0 }
 0x2e4   : > { %v1996_v17 = vadd.f32 %v3396_v51, %v1995_v23  ;;  %1417 = vmatmul.bf16.gmra.mxu2 %v3151_v63  ;;  %v1579_v5 = vpop.f32.mrf.mxu3  ;;  %v1794_v57 = vpack.c.bf16 %v1692_v21, %v1690_v19 }
 0x2e5   : > { %v1580_v26 = vadd.f32 %v1579_v5, %v3220_v34 }
 0x2e6   : > { %v2165_v56 = vadd.f32 %v3370_v11, %v1996_v17  ;;  %2034 = vmatmul.bf16.gmra.mxu0 %v1794_v57 }
 0x2e7   : > { %v1721_v42 = vmax.f32 %v1580_v26, 0.0  ;;  %v1378_v0 = vpop.f32.mrf.mxu2 }
 0x2e8   : > { %2312 = vst.msk [vmem:[%s3408_s27 + $0x40] sm:$0xff] %vm840_vm2, %v2165_v56  ;;  %v1379_v55 = vadd.f32 %v1378_v0, %v3313_v52  ;;  %v3512_v57 = vpop.f32.mrf.mxu1 }
 0x2e9   : > { %1621 = vmatmul.bf16.gmra.mxu3 %v3267_v8  ;;  %v1809_v58 = vpack.c.bf16 %v1721_v42, %v1719_v32 }
 0x2ea   : > { %v1694_v54 = vmax.f32 %v1379_v55, 0.0 }
 0x2eb   : > { %v1997_v47 = vpop.f32.mrf.mxu0  ;;  %2238 = vmatmul.bf16.gmra.mxu1 %v1809_v58 }
 0x2ec   : > { %v1998_v63 = vadd.f32 %v3396_v51, %v1997_v47  ;;  %v1582_v45 = vpop.f32.mrf.mxu3 }
 0x2ed   : > { %v1583_v46 = vadd.f32 %v1582_v45, %v3220_v34 }
 0x2ee   : > { %v2167_v11 = vadd.f32 %v3376_v10, %v1998_v63 }
 0x2ef   : > { %v1380_v20 = vpop.f32.mrf.mxu2  ;;  %v1723_v31 = vmax.f32 %v1583_v46, 0.0 }
 0x2f0   : > { %2313 = vst.msk [vmem:[%s3408_s27 + $0x48] sm:$0xff] %vm840_vm2, %v2167_v11  ;;  %v1381_v53 = vadd.f32 %v1380_v20, %v3313_v52 }
 0x2f2   : > { %v1696_v48 = vmax.f32 %v1381_v53, 0.0 }
 0x2f3   : > { %v2000_v60 = vpop.f32.mrf.mxu0 }
 0x2f4   : > { %v2001_v35 = vadd.f32 %v3396_v51, %v2000_v60  ;;  %1422 = vmatmul.bf16.gmra.mxu2 %v3169_v36  ;;  %v1584_v62 = vpop.f32.mrf.mxu3  ;;  %v1796_v2 = vpack.c.bf16 %v1696_v48, %v1694_v54 }
 0x2f5   : > { %v1585_v10 = vadd.f32 %v1584_v62, %v3220_v34 }
 0x2f6   : > { %v2170_v4 = vadd.f32 %v3381_v38, %v2001_v35  ;;  %2039 = vmatmul.bf16.gmra.mxu0 %v1796_v2 }
 0x2f7   : > { %v1725_v16 = vmax.f32 %v1585_v10, 0.0  ;;  %v1383_v27 = vpop.f32.mrf.mxu2 }
 0x2f8   : > { %2314 = vst.msk [vmem:[%s3408_s27 + $0x50] sm:$0xff] %vm840_vm2, %v2170_v4  ;;  %v1384_v3 = vadd.f32 %v1383_v27, %v3313_v52 }
 0x2f9   : > { %1626 = vmatmul.bf16.gmra.mxu3 %v3282_v40  ;;  %v1811_v12 = vpack.c.bf16 %v1725_v16, %v1723_v31 }
 0x2fa   : > { %v1698_v14 = vmax.f32 %v1384_v3, 0.0 }
 0x2fb   : > { %v2002_v30 = vpop.f32.mrf.mxu0  ;;  %2243 = vmatmul.bf16.gmra.mxu1 %v1811_v12 }
 0x2fc   : > { %v2003_v36 = vadd.f32 %v3396_v51, %v2002_v30  ;;  %v1587_v13 = vpop.f32.mrf.mxu3 }
 0x2fd   : > { %v1588_v21 = vadd.f32 %v1587_v13, %v3220_v34 }
 0x2fe   : > { %v2172_v38 = vadd.f32 %v3388_v39, %v2003_v36 }
 0x2ff   : > { %v1385_v50 = vpop.f32.mrf.mxu2  ;;  %v1727_v56 = vmax.f32 %v1588_v21, 0.0 }
 0x300   : > { %2315 = vst.msk [vmem:[%s3408_s27 + $0x58] sm:$0xff] %vm840_vm2, %v2172_v38  ;;  %v1386_v9 = vadd.f32 %v1385_v50, %v3313_v52 }
 0x302   : > { %v1700_v19 = vmax.f32 %v1386_v9, 0.0 }
 0x303   : > { %v2005_v22 = vpop.f32.mrf.mxu0 }
 0x304   : > { %v2006_v23 = vadd.f32 %v3396_v51, %v2005_v22  ;;  %1427 = vmatmul.bf16.gmra.mxu2 %v3191_v1  ;;  %v1589_v17 = vpop.f32.mrf.mxu3  ;;  %v1798_v5 = vpack.c.bf16 %v1700_v19, %v1698_v14 }
 0x305   : > { %v1590_v39 = vadd.f32 %v1589_v17, %v3220_v34 }
 0x306   : > { %v2175_v26 = vadd.f32 %v3398_v7, %v2006_v23  ;;  %2044 = vmatmul.bf16.gmra.mxu0 %v1798_v5  ;;  %v3522_v7 = vpop.f32.mrf.mxu1 }
 0x307   : > { %v1729_v32 = vmax.f32 %v1590_v39, 0.0  ;;  %v1388_v42 = vpop.f32.mrf.mxu2 }
 0x308   : > { %2316 = vst.msk [vmem:[%s3408_s27 + $0x60] sm:$0xff] %vm840_vm2, %v2175_v26  ;;  %v1389_v63 = vadd.f32 %v1388_v42, %v3313_v52 }
 0x309   : > { %v1813_v0 = vpack.c.bf16 %v1729_v32, %v1727_v56  ;;  %1631 = vmatmul.bf16.gmra.mxu3 %v3294_v6 }
 0x30a   : > { %v1702_v20 = vmax.f32 %v1389_v63, 0.0 }
 0x30b   : > { %v2007_v58 = vpop.f32.mrf.mxu0  ;;  %2248 = vmatmul.bf16.gmra.mxu1 %v1813_v0 }
 0x30c   : > { %v2008_v1 = vadd.f32 %v3396_v51, %v2007_v58  ;;  %v1592_v47 = vpop.f32.mrf.mxu3 }
 0x30d   : > { %v1593_v54 = vadd.f32 %v1592_v47, %v3220_v34 }
 0x30e   : > { %v2177_v45 = vadd.f32 %v3415_v25, %v2008_v1  ;;  %v3534_v31 = vpop.f32.mrf.mxu1 }
 0x30f   : > { %v1390_v55 = vpop.f32.mrf.mxu2  ;;  %v1731_v2 = vmax.f32 %v1593_v54, 0.0 }
 0x310   : > { %2317 = vst.msk [vmem:[%s3408_s27 + $0x68] sm:$0xff] %vm840_vm2, %v2177_v45  ;;  %v1391_v11 = vadd.f32 %v1390_v55, %v3313_v52 }
 0x312   : > { %v1704_v53 = vmax.f32 %v1391_v11, 0.0 }
 0x313   : > { %v2010_v48 = vpop.f32.mrf.mxu0 }
 0x314   : > { %v2011_v46 = vadd.f32 %v3396_v51, %v2010_v48  ;;  %1432 = vmatmul.bf16.gmra.mxu2 %v3209_v24  ;;  %v1594_v60 = vpop.f32.mrf.mxu3  ;;  %v1800_v35 = vpack.c.bf16 %v1704_v53, %v1702_v20 }
 0x315   : > { %v1595_v25 = vadd.f32 %v1594_v60, %v3220_v34 }
 0x316   : > { %v2180_v62 = vadd.f32 %v3426_v59, %v2011_v46  ;;  %2049 = vmatmul.bf16.gmra.mxu0 %v1800_v35  ;;  %v3543_v50 = vpop.f32.mrf.mxu1 }
 0x317   : > { %v1733_v10 = vmax.f32 %v1595_v25, 0.0  ;;  %v1393_v4 = vpop.f32.mrf.mxu2 }
 0x318   : > { %2318 = vst.msk [vmem:[%s3408_s27 + $0x70] sm:$0xff] %vm840_vm2, %v2180_v62  ;;  %v1394_v30 = vadd.f32 %v1393_v4, %v3313_v52 }
 0x319   : > { %v1815_v16 = vpack.c.bf16 %v1733_v10, %v1731_v2  ;;  %1636 = vmatmul.bf16.gmra.mxu3 %v3306_v37 }
 0x31a   : > { %v1706_v3 = vmax.f32 %v1394_v30, 0.0 }
 0x31b   : > { %v2012_v27 = vpop.f32.mrf.mxu0  ;;  %2253 = vmatmul.bf16.gmra.mxu1 %v1815_v16 }
 0x31c   : > { %v2013_v24 = vadd.f32 %v3396_v51, %v2012_v27  ;;  %v1597_v12 = vpop.f32.mrf.mxu3 }
 0x31d   : > { %v1598_v9 = vadd.f32 %v1597_v12, %v3220_v34 }
 0x31e   : > { %v2182_v59 = vadd.f32 %v3436_v18, %v2013_v24 }
 0x31f   : > { %v1395_v36 = vpop.f32.mrf.mxu2  ;;  %v1735_v17 = vmax.f32 %v1598_v9, 0.0 }
 0x320   : > { %2319 = vst.msk [vmem:[%s3408_s27 + $0x78] sm:$0xff] %vm840_vm2, %v2182_v59  ;;  %v1396_v13 = vadd.f32 %v1395_v36, %v3313_v52 }
 0x322   : > { %v1708_v38 = vmax.f32 %v1396_v13, 0.0 }
 0x323   : > { %v2015_v14 = vpop.f32.mrf.mxu0 }
 0x324   : > { %v2016_v19 = vadd.f32 %v3396_v51, %v2015_v14  ;;  %1437 = vmatmul.bf16.gmra.mxu2 %v3228_v49  ;;  %v1599_v21 = vpop.f32.mrf.mxu3  ;;  %v1802_v22 = vpack.c.bf16 %v1708_v38, %v1706_v3  ;;  %v3553_v49 = vpop.f32.mrf.mxu1 }
 0x325   : > { %v1600_v18 = vadd.f32 %v1599_v21, %v3220_v34 }
 0x326   : > { %v2185_v23 = vadd.f32 %v3448_v41, %v2016_v19  ;;  %2054 = vmatmul.bf16.gmra.mxu0 %v1802_v22 }
 0x327   : > { %v1737_v5 = vmax.f32 %v1600_v18, 0.0  ;;  %v1398_v39 = vpop.f32.mrf.mxu2 }
 0x328   : > { %2320 = vst.msk [vmem:[%s3408_s27 + $0x80] sm:$0xff] %vm840_vm2, %v2185_v23  ;;  %v1399_v0 = vadd.f32 %v1398_v39, %v3313_v52 }
 0x329   : > { %v1817_v26 = vpack.c.bf16 %v1737_v5, %v1735_v17 }
 0x32a   : > { %v1710_v47 = vmax.f32 %v1399_v0, 0.0 }
 0x32b   : > { %v2017_v56 = vpop.f32.mrf.mxu0  ;;  %2258 = vmatmul.bf16.gmra.mxu1 %v1817_v26 }
 0x32c   : > { %v2018_v32 = vadd.f32 %v3396_v51, %v2017_v56  ;;  %v1602_v42 = vpop.f32.mrf.mxu3  ;;  %v3565_v48 = vpop.f32.mrf.mxu1 }
 0x32d   : > { %v1603_v45 = vadd.f32 %v1602_v42, %v3220_v34 }
 0x32e   : > { %v2187_v58 = vadd.f32 %v3457_v43, %v2018_v32 }
 0x32f   : > { %v1400_v1 = vpop.f32.mrf.mxu2  ;;  %v1739_v46 = vmax.f32 %v1603_v45, 0.0 }
 0x330   : > { %2321 = vst.msk [vmem:[%s3408_s27 + $0x88] sm:$0xff] %vm840_vm2, %v2187_v58  ;;  %v1401_v41 = vadd.f32 %v1400_v1, %v3313_v52 }
 0x332   : > { %v1712_v63 = vmax.f32 %v1401_v41, 0.0 }
 0x333   : > { %v2020_v55 = vpop.f32.mrf.mxu0 }
 0x334   : > { %v2021_v11 = vadd.f32 %v3396_v51, %v2020_v55  ;;  %1442 = vmatmul.bf16.gmra.mxu2 %v3243_v15  ;;  %v1604_v20 = vpop.f32.mrf.mxu3  ;;  %v1804_v53 = vpack.c.bf16 %v1712_v63, %v1710_v47  ;;  %v3575_v27 = vpop.f32.mrf.mxu1 }
 0x335   : > { %v1605_v54 = vadd.f32 %v1604_v20, %v3220_v34 }
 0x336   : > { %v2190_v43 = vadd.f32 %v3468_v61, %v2021_v11  ;;  %2059 = vmatmul.bf16.gmra.mxu0 %v1804_v53 }
 0x337   : > { %v1741_v60 = vmax.f32 %v1605_v54, 0.0  ;;  %v1403_v35 = vpop.f32.mrf.mxu2 }
 0x338   : > { %2322 = vst.msk [vmem:[%s3408_s27 + $0x90] sm:$0xff] %vm840_vm2, %v2190_v43  ;;  %v1404_v10 = vadd.f32 %v1403_v35, %v3313_v52 }
 0x339   : > { %v1819_v25 = vpack.c.bf16 %v1741_v60, %v1739_v46 }
 0x33a   : > { %v1714_v24 = vmax.f32 %v1404_v10, 0.0 }
 0x33b   : > { %v2022_v62 = vpop.f32.mrf.mxu0  ;;  %2263 = vmatmul.bf16.gmra.mxu1 %v1819_v25 }
 0x33c   : > { %v2023_v15 = vadd.f32 %v3396_v51, %v2022_v62  ;;  %v1607_v2 = vpop.f32.mrf.mxu3  ;;  %v3584_v22 = vpop.f32.mrf.mxu1 }
 0x33d   : > { %v1608_v30 = vadd.f32 %v1607_v2, %v3220_v34 }
 0x33e   : > { %v2192_v4 = vadd.f32 %v3480_v29, %v2023_v15 }
 0x33f   : > { %v1405_v16 = vpop.f32.mrf.mxu2  ;;  %v1743_v9 = vmax.f32 %v1608_v30, 0.0 }
 0x340   : > { %2323 = vst.msk [vmem:[%s3408_s27 + $0x98] sm:$0xff] %vm840_vm2, %v2192_v4  ;;  %v1406_v61 = vadd.f32 %v1405_v16, %v3313_v52 }
 0x342   : > { %v1716_v12 = vmax.f32 %v1406_v61, 0.0 }
 0x343   : > { %v2025_v59 = vpop.f32.mrf.mxu0 }
 0x344   : > { %v2026_v36 = vadd.f32 %v3396_v51, %v2025_v59  ;;  %1447 = vmatmul.bf16.gmra.mxu2 %v3255_v44  ;;  %v1609_v13 = vpop.f32.mrf.mxu3  ;;  %v1806_v3 = vpack.c.bf16 %v1716_v12, %v1714_v24  ;;  %v3595_v41 = vpop.f32.mrf.mxu1 }
 0x345   : > { %v1610_v29 = vadd.f32 %v1609_v13, %v3220_v34 }
 0x346   : > { %v2195_v38 = vadd.f32 %v3491_v28, %v2026_v36  ;;  %2064 = vmatmul.bf16.gmra.mxu0 %v1806_v3 }
 0x347   : > { %v1745_v14 = vmax.f32 %v1610_v29, 0.0  ;;  %v1408_v19 = vpop.f32.mrf.mxu2 }
 0x348   : > { %2324 = vst.msk [vmem:[%s3408_s27 + $0xa0] sm:$0xff] %vm840_vm2, %v2195_v38  ;;  %v1409_v17 = vadd.f32 %v1408_v19, %v3313_v52 }
 0x349   : > { %v1821_v21 = vpack.c.bf16 %v1745_v14, %v1743_v9 }
 0x34a   : > { %v1718_v26 = vmax.f32 %v1409_v17, 0.0 }
 0x34b   : > { %v2027_v18 = vpop.f32.mrf.mxu0  ;;  %2268 = vmatmul.bf16.gmra.mxu1 %v1821_v21 }
 0x34c   : > { %v2028_v44 = vadd.f32 %v3396_v51, %v2027_v18  ;;  %v1612_v23 = vpop.f32.mrf.mxu3  ;;  %v3604_v46 = vpop.f32.mrf.mxu1 }
 0x34d   : > { %v1613_v32 = vadd.f32 %v1612_v23, %v3220_v34 }
 0x34e   : > { %v2197_v5 = vadd.f32 %v3501_v33, %v2028_v44 }
 0x34f   : > { %v1410_v39 = vpop.f32.mrf.mxu2  ;;  %v1747_v63 = vmax.f32 %v1613_v32, 0.0 }
 0x350   : > { %2325 = vst.msk [vmem:[%s3408_s27 + $0xa8] sm:$0xff] %vm840_vm2, %v2197_v5  ;;  %v1411_v28 = vadd.f32 %v1410_v39, %v3313_v52 }
 0x352   : > { %v1720_v56 = vmax.f32 %v1411_v28, 0.0 }
 0x353   : > { %v2030_v42 = vpop.f32.mrf.mxu0 }
 0x354   : > { %v2031_v0 = vadd.f32 %v3396_v51, %v2030_v42  ;;  %1452 = vmatmul.bf16.gmra.mxu2 %v3267_v8  ;;  %v1614_v58 = vpop.f32.mrf.mxu3  ;;  %v1808_v1 = vpack.c.bf16 %v1720_v56, %v1718_v26  ;;  %v3616_v30 = vpop.f32.mrf.mxu1 }
 0x355   : > { %v1615_v33 = vadd.f32 %v1614_v58, %v3220_v34 }
 0x356   : > { %v2200_v47 = vadd.f32 %v3512_v57, %v2031_v0  ;;  %2069 = vmatmul.bf16.gmra.mxu0 %v1808_v1 }
 0x357   : > { %v1749_v45 = vmax.f32 %v1615_v33, 0.0  ;;  %v1413_v55 = vpop.f32.mrf.mxu2 }
 0x358   : > { %2326 = vst.msk [vmem:[%s3408_s27 + $0xb0] sm:$0xff] %vm840_vm2, %v2200_v47  ;;  %v1414_v54 = vadd.f32 %v1413_v55, %v3313_v52 }
 0x359   : > { %v1823_v11 = vpack.c.bf16 %v1749_v45, %v1747_v63 }
 0x35a   : > { %v1722_v35 = vmax.f32 %v1414_v54, 0.0 }
 0x35b   : > { %v2032_v20 = vpop.f32.mrf.mxu0  ;;  %2273 = vmatmul.bf16.gmra.mxu1 %v1823_v11 }
 0x35c   : > { %v2033_v8 = vadd.f32 %v3396_v51, %v2032_v20  ;;  %v1617_v53 = vpop.f32.mrf.mxu3  ;;  %v3624_v19 = vpop.f32.mrf.mxu1 }
 0x35d   : > { %v1618_v62 = vadd.f32 %v1617_v53, %v3220_v34 }
 0x35e   : > { %v2202_v43 = vadd.f32 %v3522_v7, %v2033_v8 }
 0x35f   : > { %v1415_v60 = vpop.f32.mrf.mxu2  ;;  %v1751_v61 = vmax.f32 %v1618_v62, 0.0 }
 0x360   : > { %2327 = vst.msk [vmem:[%s3408_s27 + $0xb8] sm:$0xff] %vm840_vm2, %v2202_v43  ;;  %v1416_v57 = vadd.f32 %v1415_v60, %v3313_v52 }
 0x362   : > { %v1724_v25 = vmax.f32 %v1416_v57, 0.0 }
 0x363   : > { %v2035_v15 = vpop.f32.mrf.mxu0 }
 0x364   : > { %v1810_v2 = vpack.c.bf16 %v1724_v25, %v1722_v35  ;;  %v2036_v10 = vadd.f32 %v3396_v51, %v2035_v15  ;;  %1457 = vmatmul.bf16.gmra.mxu2 %v3282_v40  ;;  %v1619_v4 = vpop.f32.mrf.mxu3  ;;  %v3634_v58 = vpop.f32.mrf.mxu1 }
 0x365   : > { %v1620_v7 = vadd.f32 %v1619_v4, %v3220_v34 }
 0x366   : > { %v2205_v16 = vadd.f32 %v3534_v31, %v2036_v10  ;;  %2074 = vmatmul.bf16.gmra.mxu0 %v1810_v2 }
 0x367   : > { %v1753_v24 = vmax.f32 %v1620_v7, 0.0  ;;  %v1418_v12 = vpop.f32.mrf.mxu2 }
 0x368   : > { %2328 = vst.msk [vmem:[%s3408_s27 + $0xc0] sm:$0xff] %vm840_vm2, %v2205_v16  ;;  %v1419_v3 = vadd.f32 %v1418_v12, %v3313_v52 }
 0x369   : > { %v1825_v59 = vpack.c.bf16 %v1753_v24, %v1751_v61 }
 0x36a   : > { %v1726_v9 = vmax.f32 %v1419_v3, 0.0 }
 0x36b   : > { %v2037_v36 = vpop.f32.mrf.mxu0  ;;  %2278 = vmatmul.bf16.gmra.mxu1 %v1825_v59 }
 0x36c   : > { %v2038_v13 = vadd.f32 %v3396_v51, %v2037_v36  ;;  %v1622_v40 = vpop.f32.mrf.mxu3  ;;  %v3646_v54 = vpop.f32.mrf.mxu1 }
 0x36d   : > { %v1623_v21 = vadd.f32 %v1622_v40, %v3220_v34 }
 0x36e   : > { %v2207_v29 = vadd.f32 %v3543_v50, %v2038_v13 }
 0x36f   : > { %v1420_v38 = vpop.f32.mrf.mxu2  ;;  %v1755_v39 = vmax.f32 %v1623_v21, 0.0 }
 0x370   : > { %2329 = vst.msk [vmem:[%s3408_s27 + $0xc8] sm:$0xff] %vm840_vm2, %v2207_v29  ;;  %v1421_v31 = vadd.f32 %v1420_v38, %v3313_v52 }
 0x372   : > { %v1728_v14 = vmax.f32 %v1421_v31, 0.0 }
 0x373   : > { %v2040_v18 = vpop.f32.mrf.mxu0 }
 0x374   : > { %v1812_v44 = vpack.c.bf16 %v1728_v14, %v1726_v9  ;;  %v2041_v23 = vadd.f32 %v3396_v51, %v2040_v18  ;;  %1462 = vmatmul.bf16.gmra.mxu2 %v3294_v6  ;;  %v1624_v17 = vpop.f32.mrf.mxu3  ;;  %v3656_v4 = vpop.f32.mrf.mxu1 }
 0x375   : > { %v1625_v50 = vadd.f32 %v1624_v17, %v3220_v34 }
 0x376   : > { %v2210_v5 = vadd.f32 %v3553_v49, %v2041_v23  ;;  %2079 = vmatmul.bf16.gmra.mxu0 %v1812_v44 }
 0x377   : > { %v1757_v28 = vmax.f32 %v1625_v50, 0.0  ;;  %v1423_v26 = vpop.f32.mrf.mxu2 }
 0x378   : > { %2330 = vst.msk [vmem:[%s3408_s27 + $0xd0] sm:$0xff] %vm840_vm2, %v2210_v5  ;;  %v1424_v6 = vadd.f32 %v1423_v26, %v3313_v52 }
 0x379   : > { %v1827_v56 = vpack.c.bf16 %v1757_v28, %v1755_v39 }
 0x37a   : > { %v1730_v47 = vmax.f32 %v1424_v6, 0.0 }
 0x37b   : > { %v2042_v32 = vpop.f32.mrf.mxu0  ;;  %2283 = vmatmul.bf16.gmra.mxu1 %v1827_v56 }
 0x37c   : > { %v2043_v42 = vadd.f32 %v3396_v51, %v2042_v32  ;;  %v1627_v0 = vpop.f32.mrf.mxu3  ;;  %v3664_v31 = vpop.f32.mrf.mxu1 }
 0x37d   : > { %v1628_v45 = vadd.f32 %v1627_v0, %v3220_v34 }
 0x37e   : > { %v2212_v1 = vadd.f32 %v3565_v48, %v2043_v42 }
 0x37f   : > { %v1425_v33 = vpop.f32.mrf.mxu2  ;;  %v1759_v43 = vmax.f32 %v1628_v45, 0.0 }
 0x380   : > { %2331 = vst.msk [vmem:[%s3408_s27 + $0xd8] sm:$0xff] %vm840_vm2, %v2212_v1  ;;  %v1426_v49 = vadd.f32 %v1425_v33, %v3313_v52 }
 0x382   : > { %v1732_v63 = vmax.f32 %v1426_v49, 0.0 }
 0x383   : > { %v2045_v55 = vpop.f32.mrf.mxu0 }
 0x384   : > { %v1814_v11 = vpack.c.bf16 %v1732_v63, %v1730_v47  ;;  %v2046_v20 = vadd.f32 %v3396_v51, %v2045_v55  ;;  %1467 = vmatmul.bf16.gmra.mxu2 %v3306_v37  ;;  %v1629_v8 = vpop.f32.mrf.mxu3  ;;  %v2239_v42 = vpop.f32.mrf.mxu1 }
 0x385   : > { %v1630_v53 = vadd.f32 %v1629_v8, %v3220_v34 }
 0x386   : > { %v2215_v48 = vadd.f32 %v3575_v27, %v2046_v20  ;;  %2084 = vmatmul.bf16.gmra.mxu0 %v1814_v11 }
 0x387   : > { %v1761_v60 = vmax.f32 %v1630_v53, 0.0  ;;  %v1428_v57 = vpop.f32.mrf.mxu2 }
 0x388   : > { %2332 = vst.msk [vmem:[%s3408_s27 + $0xe0] sm:$0xff] %vm840_vm2, %v2215_v48  ;;  %v1429_v15 = vadd.f32 %v1428_v57, %v3313_v52 }
 0x389   : > { %v1829_v35 = vpack.c.bf16 %v1761_v60, %v1759_v43 }
 0x38a   : > { %v1734_v7 = vmax.f32 %v1429_v15, 0.0 }
 0x38b   : > { %v2047_v25 = vpop.f32.mrf.mxu0  ;;  %2288 = vmatmul.bf16.gmra.mxu1 %v1829_v35 }
 0x38c   : > { %v2048_v62 = vadd.f32 %v3396_v51, %v2047_v25  ;;  %v1632_v37 = vpop.f32.mrf.mxu3  ;;  %v2241_v55 = vpop.f32.mrf.mxu1 }
 0x38d   : > { %v1633_v61 = vadd.f32 %v1632_v37, %v3220_v34 }
 0x38e   : > { %v2217_v2 = vadd.f32 %v3584_v22, %v2048_v62 }
 0x38f   : > { %v1430_v10 = vpop.f32.mrf.mxu2  ;;  %v1763_v40 = vmax.f32 %v1633_v61, 0.0 }
 0x390   : > { %2333 = vst.msk [vmem:[%s3408_s27 + $0xe8] sm:$0xff] %vm840_vm2, %v2217_v2  ;;  %v1431_v27 = vadd.f32 %v1430_v10, %v3313_v52 }
 0x392   : > { %v1736_v16 = vmax.f32 %v1431_v27, 0.0 }
 0x393   : > { %v2050_v24 = vpop.f32.mrf.mxu0 }
 0x394   : > { %v1816_v12 = vpack.c.bf16 %v1736_v16, %v1734_v7  ;;  %v2051_v59 = vadd.f32 %v3396_v51, %v2050_v24  ;;  %v1634_v36 = vpop.f32.mrf.mxu3 }
 0x395   : > { %v1635_v13 = vadd.f32 %v1634_v36, %v3220_v34 }
 0x396   : > { %v2220_v22 = vadd.f32 %v3595_v41, %v2051_v59  ;;  %2089 = vmatmul.bf16.gmra.mxu0 %v1816_v12 }
 0x397   : > { %v1765_v3 = vmax.f32 %v1635_v13, 0.0  ;;  %v1433_v29 = vpop.f32.mrf.mxu2 }
 0x398   : > { %2334 = vst.msk [vmem:[%s3408_s27 + $0xf0] sm:$0xff] %vm840_vm2, %v2220_v22  ;;  %v1434_v18 = vadd.f32 %v1433_v29, %v3313_v52 }
 0x399   : > { %v1831_v38 = vpack.c.bf16 %v1765_v3, %v1763_v40 }
 0x39a   : > { %v1738_v17 = vmax.f32 %v1434_v18, 0.0 }
 0x39b   : > { %v2052_v9 = vpop.f32.mrf.mxu0  ;;  %2293 = vmatmul.bf16.gmra.mxu1 %v1831_v38 }
 0x39c   : > { %v2053_v14 = vadd.f32 %v3396_v51, %v2052_v9  ;;  %v1637_v21 = vpop.f32.mrf.mxu3 }
 0x39d   : > { %v1638_v5 = vadd.f32 %v1637_v21, %v3220_v34 }
 0x39e   : > { %v2222_v44 = vadd.f32 %v3604_v46, %v2053_v14 }
 0x39f   : > { %v1435_v23 = vpop.f32.mrf.mxu2  ;;  %v1767_v0 = vmax.f32 %v1638_v5, 0.0 }
 0x3a0   : > { %2335 = vst.msk [vmem:[%s3408_s27 + $0xf8] sm:$0xff] %vm840_vm2, %v2222_v44  ;;  %v1436_v41 = vadd.f32 %v1435_v23, %v3313_v52 }
 0x3a2   : > { %v1740_v50 = vmax.f32 %v1436_v41, 0.0 }
 0x3a3   : > { %v2055_v39 = vpop.f32.mrf.mxu0 }
 0x3a4   : > { %v1818_v28 = vpack.c.bf16 %v1740_v50, %v1738_v17  ;;  %v2056_v26 = vadd.f32 %v3396_v51, %v2055_v39  ;;  %v1639_v56 = vpop.f32.mrf.mxu3 }
 0x3a5   : > { %v1640_v32 = vadd.f32 %v1639_v56, %v3220_v34 }
 0x3a6   : > { %v2225_v46 = vadd.f32 %v3616_v30, %v2056_v26  ;;  %2094 = vmatmul.bf16.gmra.mxu0 %v1818_v28 }
 0x3a7   : > { %v1769_v6 = vmax.f32 %v1640_v32, 0.0  ;;  %v1438_v1 = vpop.f32.mrf.mxu2  ;;  %v3715_v32 = vld [vmem:[%s3806_s8] ss:$0 sm:$0xff] }
 0x3a8   : > { %2336 = vst.msk [vmem:[%s3408_s27 + $0x100] sm:$0xff] %vm840_vm2, %v2225_v46  ;;  %v1439_v63 = vadd.f32 %v1438_v1, %v3313_v52 }
 0x3a9   : > { %v1833_v33 = vpack.c.bf16 %v1769_v6, %v1767_v0 }
 0x3aa   : > { %v1742_v11 = vmax.f32 %v1439_v63, 0.0 }
 0x3ab   : > { %v2057_v49 = vpop.f32.mrf.mxu0  ;;  %2298 = vmatmul.bf16.vlgmr.msra.gmra.mxu3 %v1833_v33 }
 0x3ac   : > { %v2058_v47 = vadd.f32 %v3396_v51, %v2057_v49 }
 0x3ae   : > { %v2227_v45 = vadd.f32 %v3624_v19, %v2058_v47  ;;  %v2244_v19 = vpop.f32.mrf.mxu1 }
 0x3af   : > { %v1440_v34 = vpop.f32.mrf.mxu2 }
 0x3b0   : > { %2337 = vst.msk [vmem:[%s3408_s27 + $0x108] sm:$0xff] %vm840_vm2, %v2227_v45  ;;  %v1441_v30 = vadd.f32 %v1440_v34, %v3313_v52 }
 0x3b2   : > { %v1744_v20 = vmax.f32 %v1441_v30, 0.0 }
 0x3b3   : > { %v2060_v8 = vpop.f32.mrf.mxu0 }
 0x3b4   : > { %v1820_v53 = vpack.c.bf16 %v1744_v20, %v1742_v11  ;;  %v2061_v48 = vadd.f32 %v3396_v51, %v2060_v8 }
 0x3b6   : > { %v2230_v43 = vadd.f32 %v3634_v58, %v2061_v48  ;;  %2099 = vmatmul.bf16.gmra.mxu0 %v1820_v53  ;;  %v2246_v16 = vpop.f32.mrf.mxu1 }
 0x3b7   : > { %v1443_v60 = vpop.f32.mrf.mxu2 }
 0x3b8   : > { %2338 = vst.msk [vmem:[%s3408_s27 + $0x110] sm:$0xff] %vm840_vm2, %v2230_v43  ;;  %v1444_v25 = vadd.f32 %v1443_v60, %v3313_v52 }
 0x3ba   : > { %v1746_v2 = vmax.f32 %v1444_v25, 0.0 }
 0x3bb   : > { %v2062_v57 = vpop.f32.mrf.mxu0 }
 0x3bc   : > { %v2063_v35 = vadd.f32 %v3396_v51, %v2062_v57 }
 0x3be   : > { %v2232_v62 = vadd.f32 %v3646_v54, %v2063_v35  ;;  %v2249_v13 = vpop.f32.mrf.mxu1 }
 0x3bf   : > { %v1445_v37 = vpop.f32.mrf.mxu2 }
 0x3c0   : > { %2339 = vst.msk [vmem:[%s3408_s27 + $0x118] sm:$0xff] %vm840_vm2, %v2232_v62  ;;  %v1446_v15 = vadd.f32 %v1445_v37, %v3313_v52 }
 0x3c2   : > { %v1748_v58 = vmax.f32 %v1446_v15, 0.0 }
 0x3c3   : > { %v2065_v10 = vpop.f32.mrf.mxu0 }
 0x3c4   : > { %v1822_v27 = vpack.c.bf16 %v1748_v58, %v1746_v2  ;;  %v2066_v7 = vadd.f32 %v3396_v51, %v2065_v10 }
 0x3c6   : > { %v2235_v61 = vadd.f32 %v3656_v4, %v2066_v7  ;;  %2104 = vmatmul.bf16.gmra.mxu0 %v1822_v27  ;;  %v2251_v18 = vpop.f32.mrf.mxu1 }
 0x3c7   : > { %v1448_v24 = vpop.f32.mrf.mxu2 }
 0x3c8   : > { %2340 = vst.msk [vmem:[%s3408_s27 + $0x120] sm:$0xff] %vm840_vm2, %v2235_v61  ;;  %v1449_v59 = vadd.f32 %v1448_v24, %v3313_v52 }
 0x3ca   : > { %v1750_v4 = vmax.f32 %v1449_v59, 0.0 }
 0x3cb   : > { %v2067_v54 = vpop.f32.mrf.mxu0 }
 0x3cc   : > { %v2068_v12 = vadd.f32 %v3396_v51, %v2067_v54 }
 0x3ce   : > { %v2237_v36 = vadd.f32 %v3664_v31, %v2068_v12  ;;  %v2254_v28 = vpop.f32.mrf.mxu1 }
 0x3cf   : > { %v1450_v22 = vpop.f32.mrf.mxu2 }
 0x3d0   : > { %2341 = vst.msk [vmem:[%s3408_s27 + $0x128] sm:$0xff] %vm840_vm2, %v2237_v36  ;;  %v1451_v40 = vadd.f32 %v1450_v22, %v3313_v52 }
 0x3d2   : > { %v1752_v3 = vmax.f32 %v1451_v40, 0.0 }
 0x3d3   : > { %v2070_v29 = vpop.f32.mrf.mxu0 }
 0x3d4   : > { %v1824_v38 = vpack.c.bf16 %v1752_v3, %v1750_v4  ;;  %v2071_v9 = vadd.f32 %v3396_v51, %v2070_v29 }
 0x3d6   : > { %v2240_v14 = vadd.f32 %v2239_v42, %v2071_v9  ;;  %2109 = vmatmul.bf16.gmra.mxu0 %v1824_v38  ;;  %v2256_v1 = vpop.f32.mrf.mxu1 }
 0x3d7   : > { %v1453_v21 = vpop.f32.mrf.mxu2 }
 0x3d8   : > { %2342 = vst.msk [vmem:[%s3408_s27 + $0x130] sm:$0xff] %vm840_vm2, %v2240_v14  ;;  %v1454_v23 = vadd.f32 %v1453_v21, %v3313_v52 }
 0x3da   : > { %v1754_v5 = vmax.f32 %v1454_v23, 0.0 }
 0x3db   : > { %v2072_v31 = vpop.f32.mrf.mxu0 }
 0x3dc   : > { %v2073_v44 = vadd.f32 %v3396_v51, %v2072_v31 }
 0x3de   : > { %v2242_v41 = vadd.f32 %v2241_v55, %v2073_v44  ;;  %v2259_v8 = vpop.f32.mrf.mxu1 }
 0x3df   : > { %v1455_v17 = vpop.f32.mrf.mxu2 }
 0x3e0   : > { %2343 = vst.msk [vmem:[%s3408_s27 + $0x138] sm:$0xff] %vm840_vm2, %v2242_v41  ;;  %v1456_v50 = vadd.f32 %v1455_v17, %v3313_v52 }
 0x3e2   : > { %v1756_v39 = vmax.f32 %v1456_v50, 0.0 }
 0x3e3   : > { %v2075_v26 = vpop.f32.mrf.mxu0 }
 0x3e4   : > { %v1826_v56 = vpack.c.bf16 %v1756_v39, %v1754_v5  ;;  %v2076_v51 = vadd.f32 %v3715_v32, %v2075_v26 }
 0x3e6   : > { %v2245_v46 = vadd.f32 %v2244_v19, %v2076_v51  ;;  %2114 = vmatmul.bf16.gmra.mxu0 %v1826_v56  ;;  %v2261_v25 = vpop.f32.mrf.mxu1 }
 0x3e7   : > { %v1458_v42 = vpop.f32.mrf.mxu2 }
 0x3e8   : > { %2344 = vst.msk [vmem:[%s3408_s27 + $0x140] sm:$0xff] %vm840_vm2, %v2245_v46  ;;  %v1459_v33 = vadd.f32 %v1458_v42, %v3313_v52 }
 0x3ea   : > { %v1758_v45 = vmax.f32 %v1459_v33, 0.0 }
 0x3eb   : > { %v2077_v0 = vpop.f32.mrf.mxu0 }
 0x3ec   : > { %v2078_v6 = vadd.f32 %v3715_v32, %v2077_v0 }
 0x3ee   : > { %v2247_v49 = vadd.f32 %v2246_v16, %v2078_v6  ;;  %v2264_v7 = vpop.f32.mrf.mxu1 }
 0x3ef   : > { %v1460_v47 = vpop.f32.mrf.mxu2 }
 0x3f0   : > { %2345 = vst.msk [vmem:[%s3408_s27 + $0x148] sm:$0xff] %vm840_vm2, %v2247_v49  ;;  %v1461_v63 = vadd.f32 %v1460_v47, %v3313_v52 }
 0x3f2   : > { %v1760_v34 = vmax.f32 %v1461_v63, 0.0 }
 0x3f3   : > { %v2080_v30 = vpop.f32.mrf.mxu0 }
 0x3f4   : > { %v1828_v55 = vpack.c.bf16 %v1760_v34, %v1758_v45  ;;  %v2081_v11 = vadd.f32 %v3715_v32, %v2080_v30 }
 0x3f6   : > { %v2250_v20 = vadd.f32 %v2249_v13, %v2081_v11  ;;  %2119 = vmatmul.bf16.gmra.mxu0 %v1828_v55  ;;  %v2266_v3 = vpop.f32.mrf.mxu1 }
 0x3f7   : > { %v1463_v53 = vpop.f32.mrf.mxu2 }
 0x3f8   : > { %2346 = vst.msk [vmem:[%s3408_s27 + $0x150] sm:$0xff] %vm840_vm2, %v2250_v20  ;;  %v1464_v60 = vadd.f32 %v1463_v53, %v3313_v52 }
 0x3fa   : > { %v1762_v62 = vmax.f32 %v1464_v60, 0.0 }
 0x3fb   : > { %v2082_v48 = vpop.f32.mrf.mxu0 }
 0x3fc   : > { %v2083_v43 = vadd.f32 %v3715_v32, %v2082_v48 }
 0x3fe   : > { %v2252_v19 = vadd.f32 %v2251_v18, %v2083_v43  ;;  %v2269_v21 = vpop.f32.mrf.mxu1 }
 0x3ff   : > { %v1465_v57 = vpop.f32.mrf.mxu2 }
 0x400   : > { %2347 = vst.msk [vmem:[%s3408_s27 + $0x158] sm:$0xff] %vm840_vm2, %v2252_v19  ;;  %v1466_v35 = vadd.f32 %v1465_v57, %v3313_v52 }
 0x402   : > { %v1764_v37 = vmax.f32 %v1466_v35, 0.0 }
 0x403   : > { %v2085_v15 = vpop.f32.mrf.mxu0 }
 0x404   : > { %v1830_v2 = vpack.c.bf16 %v1764_v37, %v1762_v62  ;;  %v2086_v58 = vadd.f32 %v3715_v32, %v2085_v15 }
 0x406   : > { %v2255_v10 = vadd.f32 %v2254_v28, %v2086_v58  ;;  %2124 = vmatmul.bf16.gmra.mxu0 %v1830_v2  ;;  %v2271_v44 = vpop.f32.mrf.mxu1 }
 0x407   : > { %v1468_v27 = vpop.f32.mrf.mxu2 }
 0x408   : > { %2348 = vst.msk [vmem:[%s3408_s27 + $0x160] sm:$0xff] %vm840_vm2, %v2255_v10  ;;  %v1469_v24 = vadd.f32 %v1468_v27, %v3313_v52 }
 0x40a   : > { %v1766_v36 = vmax.f32 %v1469_v24, 0.0 }
 0x40b   : > { %v2087_v16 = vpop.f32.mrf.mxu0 }
 0x40c   : > { %v2088_v61 = vadd.f32 %v3715_v32, %v2087_v16 }
 0x40e   : > { %v2257_v54 = vadd.f32 %v2256_v1, %v2088_v61  ;;  %v2274_v50 = vpop.f32.mrf.mxu1 }
 0x40f   : > { %v1470_v12 = vpop.f32.mrf.mxu2 }
 0x410   : > { %2349 = vst.msk [vmem:[%s3408_s27 + $0x168] sm:$0xff] %vm840_vm2, %v2257_v54  ;;  %v1471_v59 = vadd.f32 %v1470_v12, %v3313_v52 }
 0x412   : > { %v1768_v13 = vmax.f32 %v1471_v59, 0.0 }
 0x413   : > { %v2090_v22 = vpop.f32.mrf.mxu0 }
 0x414   : > { %v1832_v40 = vpack.c.bf16 %v1768_v13, %v1766_v36  ;;  %v2091_v4 = vadd.f32 %v3715_v32, %v2090_v22 }
 0x416   : > { %v2260_v29 = vadd.f32 %v2259_v8, %v2091_v4  ;;  %2129 = vmatmul.bf16.gmra.mxu0 %v1832_v40  ;;  %v2276_v51 = vpop.f32.mrf.mxu1 }
 0x418   : > { %2350 = vst.msk [vmem:[%s3408_s27 + $0x170] sm:$0xff] %vm840_vm2, %v2260_v29 }
 0x41b   : > { %v2092_v38 = vpop.f32.mrf.mxu0 }
 0x41c   : > { %v2093_v9 = vadd.f32 %v3715_v32, %v2092_v38 }
 0x41e   : > { %v2262_v14 = vadd.f32 %v2261_v25, %v2093_v9  ;;  %v2279_v1 = vpop.f32.mrf.mxu1 }
 0x420   : > { %2351 = vst.msk [vmem:[%s3408_s27 + $0x178] sm:$0xff] %vm840_vm2, %v2262_v14 }
 0x423   : > { %v2095_v52 = vpop.f32.mrf.mxu0 }
 0x424   : > { %v2096_v18 = vadd.f32 %v3715_v32, %v2095_v52 }
 0x426   : > { %v2265_v31 = vadd.f32 %v2264_v7, %v2096_v18  ;;  %v2281_v63 = vpop.f32.mrf.mxu1 }
 0x428   : > { %2352 = vst.msk [vmem:[%s3408_s27 + $0x180] sm:$0xff] %vm840_vm2, %v2265_v31 }
 0x42b   : > { %v2097_v23 = vpop.f32.mrf.mxu0 }
 0x42c   : > { %v2098_v41 = vadd.f32 %v3715_v32, %v2097_v23 }
 0x42e   : > { %v2267_v17 = vadd.f32 %v2266_v3, %v2098_v41  ;;  %v2284_v55 = vpop.f32.mrf.mxu1  ;;  %v2299_v13 = vpop.f32.mrf.mxu3 }
 0x430   : > { %2353 = vst.msk [vmem:[%s3408_s27 + $0x188] sm:$0xff] %vm840_vm2, %v2267_v17 }
 0x433   : > { %v2100_v5 = vpop.f32.mrf.mxu0 }
 0x434   : > { %v2101_v39 = vadd.f32 %v3715_v32, %v2100_v5 }
 0x436   : > { %v2270_v28 = vadd.f32 %v2269_v21, %v2101_v39  ;;  %v2286_v43 = vpop.f32.mrf.mxu1  ;;  %v2301_v38 = vpop.f32.mrf.mxu3 }
 0x438   : > { %2354 = vst.msk [vmem:[%s3408_s27 + $0x190] sm:$0xff] %vm840_vm2, %v2270_v28 }
 0x43b   : > { %v2102_v26 = vpop.f32.mrf.mxu0 }
 0x43c   : > { %v2103_v56 = vadd.f32 %v3715_v32, %v2102_v26 }
 0x43e   : > { %v2272_v46 = vadd.f32 %v2271_v44, %v2103_v56  ;;  %v2289_v25 = vpop.f32.mrf.mxu1 }
 0x440   : > { %2355 = vst.msk [vmem:[%s3408_s27 + $0x198] sm:$0xff] %vm840_vm2, %v2272_v46 }
 0x443   : > { %v2105_v42 = vpop.f32.mrf.mxu0 }
 0x444   : > { %v2106_v0 = vadd.f32 %v3715_v32, %v2105_v42 }
 0x446   : > { %v2275_v6 = vadd.f32 %v2274_v50, %v2106_v0  ;;  %v2291_v2 = vpop.f32.mrf.mxu1 }
 0x448   : > { %2356 = vst.msk [vmem:[%s3408_s27 + $0x1a0] sm:$0xff] %vm840_vm2, %v2275_v6 }
 0x44b   : > { %v2107_v33 = vpop.f32.mrf.mxu0 }
 0x44c   : > { %v2108_v49 = vadd.f32 %v3715_v32, %v2107_v33 }
 0x44e   : > { %v2277_v47 = vadd.f32 %v2276_v51, %v2108_v49  ;;  %v2294_v7 = vpop.f32.mrf.mxu1 }
 0x450   : > { %2357 = vst.msk [vmem:[%s3408_s27 + $0x1a8] sm:$0xff] %vm840_vm2, %v2277_v47 }
 0x453   : > { %v2110_v45 = vpop.f32.mrf.mxu0 }
 0x454   : > { %v2111_v34 = vadd.f32 %v3715_v32, %v2110_v45 }
 0x456   : > { %v2280_v30 = vadd.f32 %v2279_v1, %v2111_v34  ;;  %v2296_v59 = vpop.f32.mrf.mxu1 }
 0x458   : > { %2358 = vst.msk [vmem:[%s3408_s27 + $0x1b0] sm:$0xff] %vm840_vm2, %v2280_v30 }
 0x45b   : > { %v2112_v11 = vpop.f32.mrf.mxu0 }
 0x45c   : > { %v2113_v20 = vadd.f32 %v3715_v32, %v2112_v11 }
 0x45e   : > { %v2282_v8 = vadd.f32 %v2281_v63, %v2113_v20 }
 0x460   : > { %2359 = vst.msk [vmem:[%s3408_s27 + $0x1b8] sm:$0xff] %vm840_vm2, %v2282_v8 }
 0x463   : > { %v2115_v53 = vpop.f32.mrf.mxu0 }
 0x464   : > { %v2116_v48 = vadd.f32 %v3715_v32, %v2115_v53 }
 0x466   : > { %v2285_v60 = vadd.f32 %v2284_v55, %v2116_v48 }
 0x468   : > { %2360 = vst.msk [vmem:[%s3408_s27 + $0x1c0] sm:$0xff] %vm840_vm2, %v2285_v60 }
 0x46b   : > { %v2117_v19 = vpop.f32.mrf.mxu0 }
 0x46c   : > { %v2118_v57 = vadd.f32 %v3715_v32, %v2117_v19 }
 0x46e   : > { %v2287_v35 = vadd.f32 %v2286_v43, %v2118_v57 }
 0x470   : > { %2361 = vst.msk [vmem:[%s3408_s27 + $0x1c8] sm:$0xff] %vm840_vm2, %v2287_v35 }
 0x473   : > { %v2120_v62 = vpop.f32.mrf.mxu0 }
 0x474   : > { %v2121_v37 = vadd.f32 %v3715_v32, %v2120_v62 }
 0x476   : > { %v2290_v15 = vadd.f32 %v2289_v25, %v2121_v37 }
 0x478   : > { %2362 = vst.msk [vmem:[%s3408_s27 + $0x1d0] sm:$0xff] %vm840_vm2, %v2290_v15 }
 0x47b   : > { %v2122_v58 = vpop.f32.mrf.mxu0 }
 0x47c   : > { %v2123_v10 = vadd.f32 %v3715_v32, %v2122_v58 }
 0x47e   : > { %v2292_v27 = vadd.f32 %v2291_v2, %v2123_v10 }
 0x480   : > { %2363 = vst.msk [vmem:[%s3408_s27 + $0x1d8] sm:$0xff] %vm840_vm2, %v2292_v27 }
 0x483   : > { %v2125_v16 = vpop.f32.mrf.mxu0 }
 0x484   : > { %v2126_v61 = vadd.f32 %v3715_v32, %v2125_v16 }
 0x486   : > { %v2295_v24 = vadd.f32 %v2294_v7, %v2126_v61 }
 0x488   : > { %2364 = vst.msk [vmem:[%s3408_s27 + $0x1e0] sm:$0xff] %vm840_vm2, %v2295_v24 }
 0x48b   : > { %v2127_v54 = vpop.f32.mrf.mxu0 }
 0x48c   : > { %v2128_v12 = vadd.f32 %v3715_v32, %v2127_v54 }
 0x48e   : > { %v2297_v36 = vadd.f32 %v2296_v59, %v2128_v12 }
 0x490   : > { %2365 = vst.msk [vmem:[%s3408_s27 + $0x1e8] sm:$0xff] %vm840_vm2, %v2297_v36 }
 0x493   : > { %v2130_v22 = vpop.f32.mrf.mxu0 }
 0x494   : > { %v2131_v40 = vadd.f32 %v3715_v32, %v2130_v22 }
 0x496   : > { %v2300_v4 = vadd.f32 %v2299_v13, %v2131_v40 }
 0x498   : > { %2366 = vst.msk [vmem:[%s3408_s27 + $0x1f0] sm:$0xff] %vm840_vm2, %v2300_v4 }
 0x49b   : > { %v2132_v3 = vpop.f32.mrf.mxu0 }
 0x49c   : > { %v2133_v29 = vadd.f32 %v3715_v32, %v2132_v3 }
 0x49e   : > { %v2302_v9 = vadd.f32 %v2301_v38, %v2133_v29 }
 0x4a0   : > { %2367 = vst.msk [vmem:[%s3408_s27 + $0x1f8] sm:$0xff] %vm840_vm2, %v2302_v9 }
 0x4a1 PF: > { %s19_s30 = sadd.s32 1, %s2710_s30  }
 0x4a2   : > { %p16_p4 = scmp.ge.s32.totalorder %s19_s30, 4  }
 0x4a4   :  { %18 = sbr.rel (!%p16_p4) target bundleno = 1 (0x1), region = 86 }

</bundles_post_ra>
